<compile_context>
chip_gen: v5e
topology: v5e:2x2
jax: 0.10.0
libtpu: 0.0.40
codegen_flags: <defaults>
</compile_context>

<pallas_src>
import functools

import jax
import jax.numpy as jnp
from jax.experimental import pallas as pl
from jax.experimental.pallas import tpu as pltpu


# LeNet geometry is fixed by the module (linear1 in_features=400 => 28x28).
_IMG = 28          # input spatial size
_K = 5             # conv kernel size
_PAD1 = 2          # conv1 padding
_C1 = 6            # conv1 out channels
_P1 = 14           # spatial after pool1
_H2 = 10           # spatial after conv2 (14 - 5 + 1)
_C2 = 16           # conv2 out channels
_P2 = 5            # spatial after pool2
_F1 = 120
_F2 = 84


# ----------------------------------------------------------------------------
# Fused kernel: one grid step == one image, everything VMEM-resident.
# ----------------------------------------------------------------------------
def _lenet_kernel(x_ref, m1_ref, b1_ref, q1_ref, p1_ref,
                  m2_ref, b2_ref, q2_ref, p2_ref,
                  w1_ref, fb1_ref, w2_ref, fb2_ref, w3_ref, fb3_ref,
                  o_ref, xpad_ref, *, cin):
    f32 = jnp.float32

    # ---- conv1: vertical zero-padding into a VMEM scratch (horizontal
    #      padding is folded into the band matrices m1), then K banded
    #      matmuls accumulated in f32. ---------------------------------------
    xpad_ref[...] = jnp.zeros(xpad_ref.shape, f32)
    xpad_ref[_PAD1:_PAD1 + _IMG, :] = x_ref[0]

    y1 = jnp.zeros((_IMG, _IMG * _C1), f32)                       # (28, 168)
    for ki in range(_K):
        y1 = y1 + jnp.dot(xpad_ref[ki:ki + _IMG, :], m1_ref[ki],
                          preferred_element_type=f32)
    y1 = jnp.maximum(y1 + b1_ref[...], 0.0)                       # bias + ReLU

    # ---- avg-pool 2x2 fused as two constant matmuls: (Q1 @ y1) @ P1 --------
    x2 = jnp.dot(jnp.dot(q1_ref[...], y1, preferred_element_type=f32),
                 p1_ref[...], preferred_element_type=f32)         # (14, 84)

    # ---- conv2 (valid 5x5): K banded matmuls --------------------------------
    y2 = jnp.zeros((_H2, _H2 * _C2), f32)                         # (10, 160)
    for ki in range(_K):
        y2 = y2 + jnp.dot(x2[ki:ki + _H2, :], m2_ref[ki],
                          preferred_element_type=f32)
    y2 = jnp.maximum(y2 + b2_ref[...], 0.0)

    # ---- avg-pool 2x2 --------------------------------------------------------
    x3 = jnp.dot(jnp.dot(q2_ref[...], y2, preferred_element_type=f32),
                 p2_ref[...], preferred_element_type=f32)         # (5, 80)

    # ---- linear1: each row of x3 hits its own packed weight block (the
    #      packing already applies the torch.flatten(NCHW) permutation). -----
    f1 = jnp.zeros((1, _F1), f32)
    for h in range(_P2):
        f1 = f1 + jnp.dot(x3[h:h + 1, :], w1_ref[h],
                          preferred_element_type=f32)
    f1 = jnp.maximum(f1 + fb1_ref[...], 0.0)

    # ---- linear2 + ReLU, linear3 --------------------------------------------
    f2 = jnp.maximum(jnp.dot(f1, w2_ref[...], preferred_element_type=f32)
                     + fb2_ref[...], 0.0)
    out = jnp.dot(f2, w3_ref[...], preferred_element_type=f32) + fb3_ref[...]
    o_ref[0] = out.astype(o_ref.dtype)


# ----------------------------------------------------------------------------
# One-time parameter packing (outside the jitted hot path).
# ----------------------------------------------------------------------------
def _band_matrices(w_oihw, w_in, pad):
    """M[ki][p*Cin + ci, ow*Cout + co] = w[co, ci, ki, p - ow + pad]."""
    f32 = jnp.float32
    cout, cin, k, _ = w_oihw.shape
    wo = w_in + 2 * pad - k + 1
    kj = jnp.arange(k)[:, None, None]
    p = jnp.arange(w_in)[None, :, None]
    o = jnp.arange(wo)[None, None, :]
    sel = (p == o + kj - pad).astype(f32)                   # (k, w_in, wo)
    m = jnp.einsum('kpo,ciak->apioc', sel, w_oihw.astype(f32))
    return m.reshape(k, w_in * cin, wo * cout)


def _pool_matrices(h_in, w_in, c):
    """Row/col 2x2-average matrices so that pool(x) == Q @ x @ P."""
    f32 = jnp.float32
    ho, wo = h_in // 2, w_in // 2
    q = 0.5 * (jnp.arange(ho)[:, None] ==
               jnp.arange(h_in)[None, :] // 2).astype(f32)        # (ho, h_in)
    colsel = (jnp.arange(w_in)[:, None] // 2 ==
              jnp.arange(wo)[None, :]).astype(f32)                # (w_in, wo)
    p = 0.5 * (colsel[:, None, :, None] *
               jnp.eye(c, dtype=f32)[None, :, None, :])
    return q, p.reshape(w_in * c, wo * c)


def pack_params(params):
    f32 = jnp.float32
    q1, p1 = _pool_matrices(_IMG, _IMG, _C1)
    q2, p2 = _pool_matrices(_H2, _H2, _C2)
    # linear1 weight: (120, 400) with torch feature index c*25 + h*5 + w.
    # Re-index rows to the kernel's (h, w*16 + c) layout and split per h.
    w1 = params["lin1_w"].astype(f32).reshape(_F1, _C2, _P2, _P2)  # (o,c,h,w)
    w1 = jnp.transpose(w1, (2, 3, 1, 0)).reshape(_P2, _P2 * _C2, _F1)
    return {
        "m1": _band_matrices(params["conv1_w"], _IMG, _PAD1),      # (5,28c,168)
        "b1": jnp.tile(params["conv1_b"].astype(f32), _IMG)[None, :],
        "q1": q1, "p1": p1,
        "m2": _band_matrices(params["conv2_w"], _P1, 0),           # (5,84,160)
        "b2": jnp.tile(params["conv2_b"].astype(f32), _H2)[None, :],
        "q2": q2, "p2": p2,
        "w1": w1,                                                  # (5,80,120)
        "fb1": params["lin1_b"].astype(f32)[None, :],
        "w2": params["lin2_w"].astype(f32).T,                      # (120,84)
        "fb2": params["lin2_b"].astype(f32)[None, :],
        "w3": params["lin3_w"].astype(f32).T,                      # (84,nc)
        "fb3": params["lin3_b"].astype(f32)[None, :],
    }


# ----------------------------------------------------------------------------
# Forward
# ----------------------------------------------------------------------------
def lenet_forward(x_nchw, packed):
    n, cin, h, w = x_nchw.shape
    assert (h, w) == (_IMG, _IMG), "linear1 (400 feats) requires 28x28 input"
    n_classes = packed["w3"].shape[1]
    # NCHW -> per-image (H, W*Cin) slab, channel fastest (free when Cin == 1).
    x = jnp.transpose(x_nchw, (0, 2, 3, 1)).reshape(n, _IMG, _IMG * cin)
    x = x.astype(jnp.float32)

    flops = n * (
        2 * _K * _IMG * (_IMG * cin) * (_IMG * _C1)                    # conv1
        + 2 * (_P1 * _IMG * (_IMG * _C1)
               + _P1 * (_IMG * _C1) * (_P1 * _C1))                     # pool1
        + 2 * _K * _H2 * (_P1 * _C1) * (_H2 * _C2)                     # conv2
        + 2 * (_P2 * _H2 * (_H2 * _C2)
               + _P2 * (_H2 * _C2) * (_P2 * _C2))                      # pool2
        + 2 * (_P2 * _P2 * _C2 * _F1 + _F1 * _F2 + _F2 * n_classes))   # fc
    bytes_accessed = 4 * (x.size + sum(v.size for v in packed.values())
                          + n * n_classes)

    def _full_spec(a):
        zeros = (0,) * a.ndim
        return pl.BlockSpec(a.shape, lambda i, z=zeros: z)

    out = pl.pallas_call(
        functools.partial(_lenet_kernel, cin=cin),
        out_shape=jax.ShapeDtypeStruct((n, 1, n_classes), jnp.float32),
        grid_spec=pltpu.PrefetchScalarGridSpec(
            num_scalar_prefetch=0,
            grid=(n,),
            in_specs=[
                pl.BlockSpec((1, _IMG, _IMG * cin), lambda i: (i, 0, 0)),
                _full_spec(packed["m1"]), _full_spec(packed["b1"]),
                _full_spec(packed["q1"]), _full_spec(packed["p1"]),
                _full_spec(packed["m2"]), _full_spec(packed["b2"]),
                _full_spec(packed["q2"]), _full_spec(packed["p2"]),
                _full_spec(packed["w1"]), _full_spec(packed["fb1"]),
                _full_spec(packed["w2"]), _full_spec(packed["fb2"]),
                _full_spec(packed["w3"]), _full_spec(packed["fb3"]),
            ],
            out_specs=pl.BlockSpec((1, 1, n_classes), lambda i: (i, 0, 0)),
            scratch_shapes=[
                pltpu.VMEM((_IMG + 2 * _PAD1, _IMG * cin), jnp.float32)],
        ),
        compiler_params=pltpu.CompilerParams(
            dimension_semantics=("parallel",)),
        cost_estimate=pl.CostEstimate(
            flops=flops, transcendentals=0, bytes_accessed=bytes_accessed),
    )(x, packed["m1"], packed["b1"], packed["q1"], packed["p1"],
      packed["m2"], packed["b2"], packed["q2"], packed["p2"],
      packed["w1"], packed["fb1"], packed["w2"], packed["fb2"],
      packed["w3"], packed["fb3"])
    return out.reshape(n, n_classes)


# ----------------------------------------------------------------------------
# Pure-JAX reference (for validation) and param init
# ----------------------------------------------------------------------------
def _reference_forward(x_nchw, params):
    hp = jax.lax.Precision.HIGHEST
    y = jax.lax.conv_general_dilated(
        x_nchw, params["conv1_w"], (1, 1), ((_PAD1, _PAD1), (_PAD1, _PAD1)),
        dimension_numbers=("NCHW", "OIHW", "NCHW"), precision=hp)
    y = jax.nn.relu(y + params["conv1_b"][None, :, None, None])
    y = y.reshape(y.shape[0], _C1, _P1, 2, _P1, 2).mean(axis=(3, 5))
    y = jax.lax.conv_general_dilated(
        y, params["conv2_w"], (1, 1), "VALID",
        dimension_numbers=("NCHW", "OIHW", "NCHW"), precision=hp)
    y = jax.nn.relu(y + params["conv2_b"][None, :, None, None])
    y = y.reshape(y.shape[0], _C2, _P2, 2, _P2, 2).mean(axis=(3, 5))
    y = y.reshape(y.shape[0], -1)
    y = jax.nn.relu(jnp.dot(y, params["lin1_w"].T, precision=hp)
                    + params["lin1_b"])
    y = jax.nn.relu(jnp.dot(y, params["lin2_w"].T, precision=hp)
                    + params["lin2_b"])
    return jnp.dot(y, params["lin3_w"].T, precision=hp) + params["lin3_b"]


def init_params(key, in_channels=1, n_classes=10):
    ks = jax.random.split(key, 10)
    s = 0.05
    return {
        "conv1_w": jax.random.normal(ks[0], (6, in_channels, 5, 5), jnp.float32) * s,
        "conv1_b": jax.random.normal(ks[1], (6,), jnp.float32) * s,
        "conv2_w": jax.random.normal(ks[2], (16, 6, 5, 5), jnp.float32) * s,
        "conv2_b": jax.random.normal(ks[3], (16,), jnp.float32) * s,
        "lin1_w": jax.random.normal(ks[4], (120, 400), jnp.float32) * s,
        "lin1_b": jax.random.normal(ks[5], (120,), jnp.float32) * s,
        "lin2_w": jax.random.normal(ks[6], (84, 120), jnp.float32) * s,
        "lin2_b": jax.random.normal(ks[7], (84,), jnp.float32) * s,
        "lin3_w": jax.random.normal(ks[8], (n_classes, 84), jnp.float32) * s,
        "lin3_b": jax.random.normal(ks[9], (n_classes,), jnp.float32) * s,
    }


if __name__ == "__main__":
    key = jax.random.PRNGKey(0)
    k_x, k_p = jax.random.split(key)
    # LeNet's linear1 (400 = 16*5*5) fixes the spatial size at 28x28.
    x = jax.random.normal(k_x, (2, 1, 28, 28), jnp.float32)   # NCHW
    params = init_params(k_p, in_channels=1, n_classes=10)
    packed = pack_params(params)        # one-time packing, outside the hot path

    fwd = jax.jit(lenet_forward)
    logits = jax.block_until_ready(fwd(x, packed))

    assert logits.shape == (2, 10), logits.shape
    assert bool(jnp.all(jnp.isfinite(logits)))
    ref = _reference_forward(x, params)
    assert bool(jnp.allclose(logits, ref, atol=1e-3, rtol=1e-3)), \
        float(jnp.max(jnp.abs(logits - ref)))
    print("KERNEL_OK")
</pallas_src>

<mosaic_0001>
module attributes {stable_mosaic.version = 11 : i64} {
  func.func @_lenet_kernel(%arg0: i32, %arg1: memref<1x28x28xf32, #tpu.memory_space<vmem>>, %arg2: memref<5x28x168xf32, #tpu.memory_space<vmem>>, %arg3: memref<1x168xf32, #tpu.memory_space<vmem>>, %arg4: memref<14x28xf32, #tpu.memory_space<vmem>>, %arg5: memref<168x84xf32, #tpu.memory_space<vmem>>, %arg6: memref<5x84x160xf32, #tpu.memory_space<vmem>>, %arg7: memref<1x160xf32, #tpu.memory_space<vmem>>, %arg8: memref<5x10xf32, #tpu.memory_space<vmem>>, %arg9: memref<160x80xf32, #tpu.memory_space<vmem>>, %arg10: memref<5x80x120xf32, #tpu.memory_space<vmem>>, %arg11: memref<1x120xf32, #tpu.memory_space<vmem>>, %arg12: memref<120x84xf32, #tpu.memory_space<vmem>>, %arg13: memref<1x84xf32, #tpu.memory_space<vmem>>, %arg14: memref<84x10xf32, #tpu.memory_space<vmem>>, %arg15: memref<1x10xf32, #tpu.memory_space<vmem>>, %arg16: memref<1x1x10xf32, #tpu.memory_space<vmem>>, %arg17: memref<32x28xf32, #tpu.memory_space<vmem>>) attributes {dimension_semantics = [#tpu.dimension_semantics<parallel>], iteration_bounds = array<i64: 2>, scalar_prefetch = 0 : i64, scratch_operands = 1 : i64, tpu.core_type = #tpu.core_type<tc>, window_params = [{transform_indices = @transform_0, window_bounds = array<i64: 1, 28, 28>}, {pipeline_mode = #tpu.pipeline_mode<synchronous>, transform_indices = @transform_1, window_bounds = array<i64: 5, 28, 168>}, {pipeline_mode = #tpu.pipeline_mode<synchronous>, transform_indices = @transform_2, window_bounds = array<i64: 1, 168>}, {pipeline_mode = #tpu.pipeline_mode<synchronous>, transform_indices = @transform_3, window_bounds = array<i64: 14, 28>}, {pipeline_mode = #tpu.pipeline_mode<synchronous>, transform_indices = @transform_4, window_bounds = array<i64: 168, 84>}, {pipeline_mode = #tpu.pipeline_mode<synchronous>, transform_indices = @transform_5, window_bounds = array<i64: 5, 84, 160>}, {pipeline_mode = #tpu.pipeline_mode<synchronous>, transform_indices = @transform_6, window_bounds = array<i64: 1, 160>}, {pipeline_mode = #tpu.pipeline_mode<synchronous>, transform_indices = @transform_7, window_bounds = array<i64: 5, 10>}, {pipeline_mode = #tpu.pipeline_mode<synchronous>, transform_indices = @transform_8, window_bounds = array<i64: 160, 80>}, {pipeline_mode = #tpu.pipeline_mode<synchronous>, transform_indices = @transform_9, window_bounds = array<i64: 5, 80, 120>}, {pipeline_mode = #tpu.pipeline_mode<synchronous>, transform_indices = @transform_10, window_bounds = array<i64: 1, 120>}, {pipeline_mode = #tpu.pipeline_mode<synchronous>, transform_indices = @transform_11, window_bounds = array<i64: 120, 84>}, {pipeline_mode = #tpu.pipeline_mode<synchronous>, transform_indices = @transform_12, window_bounds = array<i64: 1, 84>}, {pipeline_mode = #tpu.pipeline_mode<synchronous>, transform_indices = @transform_13, window_bounds = array<i64: 84, 10>}, {pipeline_mode = #tpu.pipeline_mode<synchronous>, transform_indices = @transform_14, window_bounds = array<i64: 1, 10>}, {transform_indices = @transform_15, window_bounds = array<i64: 1, 1, 10>}]} {
    %cst = arith.constant 0.000000e+00 : f32
    %0 = vector.broadcast %cst : f32 to vector<32x28xf32>
    %c0 = arith.constant 0 : index
    %c0_0 = arith.constant 0 : index
    %1 = vector.load %arg17[%c0, %c0_0] : memref<32x28xf32, #tpu.memory_space<vmem>>, vector<32x28xf32>
    tpu.vector_store %arg17[%c0, %c0_0], %0 {strides = array<i32>} : memref<32x28xf32, #tpu.memory_space<vmem>>, vector<32x28xf32>,
    %c0_1 = arith.constant 0 : index
    %c0_2 = arith.constant 0 : index
    %c0_3 = arith.constant 0 : index
    %2 = vector.load %arg1[%c0_1, %c0_2, %c0_3] : memref<1x28x28xf32, #tpu.memory_space<vmem>>, vector<1x28x28xf32>
    %3 = vector.shape_cast %2 : vector<1x28x28xf32> to vector<28x28xf32>
    %c2 = arith.constant 2 : index
    %c0_4 = arith.constant 0 : index
    %4 = vector.load %arg17[%c2, %c0_4] : memref<32x28xf32, #tpu.memory_space<vmem>>, vector<28x28xf32>
    tpu.vector_store %arg17[%c2, %c0_4], %3 {strides = array<i32>} : memref<32x28xf32, #tpu.memory_space<vmem>>, vector<28x28xf32>,
    %cst_5 = arith.constant 0.000000e+00 : f32
    %5 = vector.broadcast %cst_5 : f32 to vector<28x168xf32>
    %c0_6 = arith.constant 0 : index
    %c0_7 = arith.constant 0 : index
    %6 = vector.load %arg17[%c0_6, %c0_7] : memref<32x28xf32, #tpu.memory_space<vmem>>, vector<28x28xf32>
    %c0_8 = arith.constant 0 : index
    %c0_9 = arith.constant 0 : index
    %c0_10 = arith.constant 0 : index
    %7 = vector.load %arg2[%c0_8, %c0_9, %c0_10] : memref<5x28x168xf32, #tpu.memory_space<vmem>>, vector<1x28x168xf32>
    %8 = vector.shape_cast %7 : vector<1x28x168xf32> to vector<28x168xf32>
    %cst_11 = arith.constant dense<0.000000e+00> : vector<28x168xf32>
    %9 = tpu.matmul %6, %8, %cst_11 {dimension_numbers = #tpu.dot_dimension_numbers<[1], [0], [0], [1], [0, 0, 1, 1], [], []>} : vector<28x28xf32>, vector<28x168xf32>, vector<28x168xf32> -> vector<28x168xf32>
    %10 = arith.addf %5, %9 : vector<28x168xf32>
    %c1 = arith.constant 1 : index
    %c0_12 = arith.constant 0 : index
    %11 = vector.load %arg17[%c1, %c0_12] : memref<32x28xf32, #tpu.memory_space<vmem>>, vector<28x28xf32>
    %c1_13 = arith.constant 1 : index
    %c0_14 = arith.constant 0 : index
    %c0_15 = arith.constant 0 : index
    %12 = vector.load %arg2[%c1_13, %c0_14, %c0_15] : memref<5x28x168xf32, #tpu.memory_space<vmem>>, vector<1x28x168xf32>
    %13 = vector.shape_cast %12 : vector<1x28x168xf32> to vector<28x168xf32>
    %cst_16 = arith.constant dense<0.000000e+00> : vector<28x168xf32>
    %14 = tpu.matmul %11, %13, %cst_16 {dimension_numbers = #tpu.dot_dimension_numbers<[1], [0], [0], [1], [0, 0, 1, 1], [], []>} : vector<28x28xf32>, vector<28x168xf32>, vector<28x168xf32> -> vector<28x168xf32>
    %15 = arith.addf %10, %14 : vector<28x168xf32>
    %c2_17 = arith.constant 2 : index
    %c0_18 = arith.constant 0 : index
    %16 = vector.load %arg17[%c2_17, %c0_18] : memref<32x28xf32, #tpu.memory_space<vmem>>, vector<28x28xf32>
    %c2_19 = arith.constant 2 : index
    %c0_20 = arith.constant 0 : index
    %c0_21 = arith.constant 0 : index
    %17 = vector.load %arg2[%c2_19, %c0_20, %c0_21] : memref<5x28x168xf32, #tpu.memory_space<vmem>>, vector<1x28x168xf32>
    %18 = vector.shape_cast %17 : vector<1x28x168xf32> to vector<28x168xf32>
    %cst_22 = arith.constant dense<0.000000e+00> : vector<28x168xf32>
    %19 = tpu.matmul %16, %18, %cst_22 {dimension_numbers = #tpu.dot_dimension_numbers<[1], [0], [0], [1], [0, 0, 1, 1], [], []>} : vector<28x28xf32>, vector<28x168xf32>, vector<28x168xf32> -> vector<28x168xf32>
    %20 = arith.addf %15, %19 : vector<28x168xf32>
    %c3 = arith.constant 3 : index
    %c0_23 = arith.constant 0 : index
    %21 = vector.load %arg17[%c3, %c0_23] : memref<32x28xf32, #tpu.memory_space<vmem>>, vector<28x28xf32>
    %c3_24 = arith.constant 3 : index
    %c0_25 = arith.constant 0 : index
    %c0_26 = arith.constant 0 : index
    %22 = vector.load %arg2[%c3_24, %c0_25, %c0_26] : memref<5x28x168xf32, #tpu.memory_space<vmem>>, vector<1x28x168xf32>
    %23 = vector.shape_cast %22 : vector<1x28x168xf32> to vector<28x168xf32>
    %cst_27 = arith.constant dense<0.000000e+00> : vector<28x168xf32>
    %24 = tpu.matmul %21, %23, %cst_27 {dimension_numbers = #tpu.dot_dimension_numbers<[1], [0], [0], [1], [0, 0, 1, 1], [], []>} : vector<28x28xf32>, vector<28x168xf32>, vector<28x168xf32> -> vector<28x168xf32>
    %25 = arith.addf %20, %24 : vector<28x168xf32>
    %c4 = arith.constant 4 : index
    %c0_28 = arith.constant 0 : index
    %26 = vector.load %arg17[%c4, %c0_28] : memref<32x28xf32, #tpu.memory_space<vmem>>, vector<28x28xf32>
    %c4_29 = arith.constant 4 : index
    %c0_30 = arith.constant 0 : index
    %c0_31 = arith.constant 0 : index
    %27 = vector.load %arg2[%c4_29, %c0_30, %c0_31] : memref<5x28x168xf32, #tpu.memory_space<vmem>>, vector<1x28x168xf32>
    %28 = vector.shape_cast %27 : vector<1x28x168xf32> to vector<28x168xf32>
    %cst_32 = arith.constant dense<0.000000e+00> : vector<28x168xf32>
    %29 = tpu.matmul %26, %28, %cst_32 {dimension_numbers = #tpu.dot_dimension_numbers<[1], [0], [0], [1], [0, 0, 1, 1], [], []>} : vector<28x28xf32>, vector<28x168xf32>, vector<28x168xf32> -> vector<28x168xf32>
    %30 = arith.addf %25, %29 : vector<28x168xf32>
    %c0_33 = arith.constant 0 : index
    %c0_34 = arith.constant 0 : index
    %31 = vector.load %arg3[%c0_33, %c0_34] : memref<1x168xf32, #tpu.memory_space<vmem>>, vector<1x168xf32>
    %32 = vector.broadcast %31 : vector<1x168xf32> to vector<28x168xf32>
    %33 = arith.addf %30, %32 : vector<28x168xf32>
    %cst_35 = arith.constant 0.000000e+00 : f32
    %34 = vector.broadcast %cst_35 : f32 to vector<28x168xf32>
    %35 = arith.maximumf %33, %34 : vector<28x168xf32>
    %c0_36 = arith.constant 0 : index
    %c0_37 = arith.constant 0 : index
    %36 = vector.load %arg4[%c0_36, %c0_37] : memref<14x28xf32, #tpu.memory_space<vmem>>, vector<14x28xf32>
    %cst_38 = arith.constant dense<0.000000e+00> : vector<14x168xf32>
    %37 = tpu.matmul %36, %35, %cst_38 {dimension_numbers = #tpu.dot_dimension_numbers<[1], [0], [0], [1], [0, 0, 1, 1], [], []>} : vector<14x28xf32>, vector<28x168xf32>, vector<14x168xf32> -> vector<14x168xf32>
    %c0_39 = arith.constant 0 : index
    %c0_40 = arith.constant 0 : index
    %38 = vector.load %arg5[%c0_39, %c0_40] : memref<168x84xf32, #tpu.memory_space<vmem>>, vector<168x84xf32>
    %cst_41 = arith.constant dense<0.000000e+00> : vector<14x84xf32>
    %39 = tpu.matmul %37, %38, %cst_41 {dimension_numbers = #tpu.dot_dimension_numbers<[1], [0], [0], [1], [0, 0, 1, 1], [], []>} : vector<14x168xf32>, vector<168x84xf32>, vector<14x84xf32> -> vector<14x84xf32>
    %cst_42 = arith.constant 0.000000e+00 : f32
    %40 = vector.broadcast %cst_42 : f32 to vector<10x160xf32>
    %41 = vector.extract_strided_slice %39 {offsets = [0, 0], sizes = [10, 84], strides = [1, 1]} : vector<14x84xf32> to vector<10x84xf32>
    %c0_43 = arith.constant 0 : index
    %c0_44 = arith.constant 0 : index
    %c0_45 = arith.constant 0 : index
    %42 = vector.load %arg6[%c0_43, %c0_44, %c0_45] : memref<5x84x160xf32, #tpu.memory_space<vmem>>, vector<1x84x160xf32>
    %43 = vector.shape_cast %42 : vector<1x84x160xf32> to vector<84x160xf32>
    %cst_46 = arith.constant dense<0.000000e+00> : vector<10x160xf32>
    %44 = tpu.matmul %41, %43, %cst_46 {dimension_numbers = #tpu.dot_dimension_numbers<[1], [0], [0], [1], [0, 0, 1, 1], [], []>} : vector<10x84xf32>, vector<84x160xf32>, vector<10x160xf32> -> vector<10x160xf32>
    %45 = arith.addf %40, %44 : vector<10x160xf32>
    %46 = vector.extract_strided_slice %39 {offsets = [1, 0], sizes = [10, 84], strides = [1, 1]} : vector<14x84xf32> to vector<10x84xf32>
    %c1_47 = arith.constant 1 : index
    %c0_48 = arith.constant 0 : index
    %c0_49 = arith.constant 0 : index
    %47 = vector.load %arg6[%c1_47, %c0_48, %c0_49] : memref<5x84x160xf32, #tpu.memory_space<vmem>>, vector<1x84x160xf32>
    %48 = vector.shape_cast %47 : vector<1x84x160xf32> to vector<84x160xf32>
    %cst_50 = arith.constant dense<0.000000e+00> : vector<10x160xf32>
    %49 = tpu.matmul %46, %48, %cst_50 {dimension_numbers = #tpu.dot_dimension_numbers<[1], [0], [0], [1], [0, 0, 1, 1], [], []>} : vector<10x84xf32>, vector<84x160xf32>, vector<10x160xf32> -> vector<10x160xf32>
    %50 = arith.addf %45, %49 : vector<10x160xf32>
    %51 = vector.extract_strided_slice %39 {offsets = [2, 0], sizes = [10, 84], strides = [1, 1]} : vector<14x84xf32> to vector<10x84xf32>
    %c2_51 = arith.constant 2 : index
    %c0_52 = arith.constant 0 : index
    %c0_53 = arith.constant 0 : index
    %52 = vector.load %arg6[%c2_51, %c0_52, %c0_53] : memref<5x84x160xf32, #tpu.memory_space<vmem>>, vector<1x84x160xf32>
    %53 = vector.shape_cast %52 : vector<1x84x160xf32> to vector<84x160xf32>
    %cst_54 = arith.constant dense<0.000000e+00> : vector<10x160xf32>
    %54 = tpu.matmul %51, %53, %cst_54 {dimension_numbers = #tpu.dot_dimension_numbers<[1], [0], [0], [1], [0, 0, 1, 1], [], []>} : vector<10x84xf32>, vector<84x160xf32>, vector<10x160xf32> -> vector<10x160xf32>
    %55 = arith.addf %50, %54 : vector<10x160xf32>
    %56 = vector.extract_strided_slice %39 {offsets = [3, 0], sizes = [10, 84], strides = [1, 1]} : vector<14x84xf32> to vector<10x84xf32>
    %c3_55 = arith.constant 3 : index
    %c0_56 = arith.constant 0 : index
    %c0_57 = arith.constant 0 : index
    %57 = vector.load %arg6[%c3_55, %c0_56, %c0_57] : memref<5x84x160xf32, #tpu.memory_space<vmem>>, vector<1x84x160xf32>
    %58 = vector.shape_cast %57 : vector<1x84x160xf32> to vector<84x160xf32>
    %cst_58 = arith.constant dense<0.000000e+00> : vector<10x160xf32>
    %59 = tpu.matmul %56, %58, %cst_58 {dimension_numbers = #tpu.dot_dimension_numbers<[1], [0], [0], [1], [0, 0, 1, 1], [], []>} : vector<10x84xf32>, vector<84x160xf32>, vector<10x160xf32> -> vector<10x160xf32>
    %60 = arith.addf %55, %59 : vector<10x160xf32>
    %61 = vector.extract_strided_slice %39 {offsets = [4, 0], sizes = [10, 84], strides = [1, 1]} : vector<14x84xf32> to vector<10x84xf32>
    %c4_59 = arith.constant 4 : index
    %c0_60 = arith.constant 0 : index
    %c0_61 = arith.constant 0 : index
    %62 = vector.load %arg6[%c4_59, %c0_60, %c0_61] : memref<5x84x160xf32, #tpu.memory_space<vmem>>, vector<1x84x160xf32>
    %63 = vector.shape_cast %62 : vector<1x84x160xf32> to vector<84x160xf32>
    %cst_62 = arith.constant dense<0.000000e+00> : vector<10x160xf32>
    %64 = tpu.matmul %61, %63, %cst_62 {dimension_numbers = #tpu.dot_dimension_numbers<[1], [0], [0], [1], [0, 0, 1, 1], [], []>} : vector<10x84xf32>, vector<84x160xf32>, vector<10x160xf32> -> vector<10x160xf32>
    %65 = arith.addf %60, %64 : vector<10x160xf32>
    %c0_63 = arith.constant 0 : index
    %c0_64 = arith.constant 0 : index
    %66 = vector.load %arg7[%c0_63, %c0_64] : memref<1x160xf32, #tpu.memory_space<vmem>>, vector<1x160xf32>
    %67 = vector.broadcast %66 : vector<1x160xf32> to vector<10x160xf32>
    %68 = arith.addf %65, %67 : vector<10x160xf32>
    %cst_65 = arith.constant 0.000000e+00 : f32
    %69 = vector.broadcast %cst_65 : f32 to vector<10x160xf32>
    %70 = arith.maximumf %68, %69 : vector<10x160xf32>
    %c0_66 = arith.constant 0 : index
    %c0_67 = arith.constant 0 : index
    %71 = vector.load %arg8[%c0_66, %c0_67] : memref<5x10xf32, #tpu.memory_space<vmem>>, vector<5x10xf32>
    %cst_68 = arith.constant dense<0.000000e+00> : vector<5x160xf32>
    %72 = tpu.matmul %71, %70, %cst_68 {dimension_numbers = #tpu.dot_dimension_numbers<[1], [0], [0], [1], [0, 0, 1, 1], [], []>} : vector<5x10xf32>, vector<10x160xf32>, vector<5x160xf32> -> vector<5x160xf32>
    %c0_69 = arith.constant 0 : index
    %c0_70 = arith.constant 0 : index
    %73 = vector.load %arg9[%c0_69, %c0_70] : memref<160x80xf32, #tpu.memory_space<vmem>>, vector<160x80xf32>
    %cst_71 = arith.constant dense<0.000000e+00> : vector<5x80xf32>
    %74 = tpu.matmul %72, %73, %cst_71 {dimension_numbers = #tpu.dot_dimension_numbers<[1], [0], [0], [1], [0, 0, 1, 1], [], []>} : vector<5x160xf32>, vector<160x80xf32>, vector<5x80xf32> -> vector<5x80xf32>
    %cst_72 = arith.constant 0.000000e+00 : f32
    %75 = vector.broadcast %cst_72 : f32 to vector<1x120xf32>
    %76 = vector.extract_strided_slice %74 {offsets = [0, 0], sizes = [1, 80], strides = [1, 1]} : vector<5x80xf32> to vector<1x80xf32>
    %c0_73 = arith.constant 0 : index
    %c0_74 = arith.constant 0 : index
    %c0_75 = arith.constant 0 : index
    %77 = vector.load %arg10[%c0_73, %c0_74, %c0_75] : memref<5x80x120xf32, #tpu.memory_space<vmem>>, vector<1x80x120xf32>
    %78 = vector.shape_cast %77 : vector<1x80x120xf32> to vector<80x120xf32>
    %cst_76 = arith.constant dense<0.000000e+00> : vector<1x120xf32>
    %79 = tpu.matmul %76, %78, %cst_76 {dimension_numbers = #tpu.dot_dimension_numbers<[1], [0], [0], [1], [0, 0, 1, 1], [], []>} : vector<1x80xf32>, vector<80x120xf32>, vector<1x120xf32> -> vector<1x120xf32>
    %80 = arith.addf %75, %79 : vector<1x120xf32>
    %81 = vector.extract_strided_slice %74 {offsets = [1, 0], sizes = [1, 80], strides = [1, 1]} : vector<5x80xf32> to vector<1x80xf32>
    %c1_77 = arith.constant 1 : index
    %c0_78 = arith.constant 0 : index
    %c0_79 = arith.constant 0 : index
    %82 = vector.load %arg10[%c1_77, %c0_78, %c0_79] : memref<5x80x120xf32, #tpu.memory_space<vmem>>, vector<1x80x120xf32>
    %83 = vector.shape_cast %82 : vector<1x80x120xf32> to vector<80x120xf32>
    %cst_80 = arith.constant dense<0.000000e+00> : vector<1x120xf32>
    %84 = tpu.matmul %81, %83, %cst_80 {dimension_numbers = #tpu.dot_dimension_numbers<[1], [0], [0], [1], [0, 0, 1, 1], [], []>} : vector<1x80xf32>, vector<80x120xf32>, vector<1x120xf32> -> vector<1x120xf32>
    %85 = arith.addf %80, %84 : vector<1x120xf32>
    %86 = vector.extract_strided_slice %74 {offsets = [2, 0], sizes = [1, 80], strides = [1, 1]} : vector<5x80xf32> to vector<1x80xf32>
    %c2_81 = arith.constant 2 : index
    %c0_82 = arith.constant 0 : index
    %c0_83 = arith.constant 0 : index
    %87 = vector.load %arg10[%c2_81, %c0_82, %c0_83] : memref<5x80x120xf32, #tpu.memory_space<vmem>>, vector<1x80x120xf32>
    %88 = vector.shape_cast %87 : vector<1x80x120xf32> to vector<80x120xf32>
    %cst_84 = arith.constant dense<0.000000e+00> : vector<1x120xf32>
    %89 = tpu.matmul %86, %88, %cst_84 {dimension_numbers = #tpu.dot_dimension_numbers<[1], [0], [0], [1], [0, 0, 1, 1], [], []>} : vector<1x80xf32>, vector<80x120xf32>, vector<1x120xf32> -> vector<1x120xf32>
    %90 = arith.addf %85, %89 : vector<1x120xf32>
    %91 = vector.extract_strided_slice %74 {offsets = [3, 0], sizes = [1, 80], strides = [1, 1]} : vector<5x80xf32> to vector<1x80xf32>
    %c3_85 = arith.constant 3 : index
    %c0_86 = arith.constant 0 : index
    %c0_87 = arith.constant 0 : index
    %92 = vector.load %arg10[%c3_85, %c0_86, %c0_87] : memref<5x80x120xf32, #tpu.memory_space<vmem>>, vector<1x80x120xf32>
    %93 = vector.shape_cast %92 : vector<1x80x120xf32> to vector<80x120xf32>
    %cst_88 = arith.constant dense<0.000000e+00> : vector<1x120xf32>
    %94 = tpu.matmul %91, %93, %cst_88 {dimension_numbers = #tpu.dot_dimension_numbers<[1], [0], [0], [1], [0, 0, 1, 1], [], []>} : vector<1x80xf32>, vector<80x120xf32>, vector<1x120xf32> -> vector<1x120xf32>
    %95 = arith.addf %90, %94 : vector<1x120xf32>
    %96 = vector.extract_strided_slice %74 {offsets = [4, 0], sizes = [1, 80], strides = [1, 1]} : vector<5x80xf32> to vector<1x80xf32>
    %c4_89 = arith.constant 4 : index
    %c0_90 = arith.constant 0 : index
    %c0_91 = arith.constant 0 : index
    %97 = vector.load %arg10[%c4_89, %c0_90, %c0_91] : memref<5x80x120xf32, #tpu.memory_space<vmem>>, vector<1x80x120xf32>
    %98 = vector.shape_cast %97 : vector<1x80x120xf32> to vector<80x120xf32>
    %cst_92 = arith.constant dense<0.000000e+00> : vector<1x120xf32>
    %99 = tpu.matmul %96, %98, %cst_92 {dimension_numbers = #tpu.dot_dimension_numbers<[1], [0], [0], [1], [0, 0, 1, 1], [], []>} : vector<1x80xf32>, vector<80x120xf32>, vector<1x120xf32> -> vector<1x120xf32>
    %100 = arith.addf %95, %99 : vector<1x120xf32>
    %c0_93 = arith.constant 0 : index
    %c0_94 = arith.constant 0 : index
    %101 = vector.load %arg11[%c0_93, %c0_94] : memref<1x120xf32, #tpu.memory_space<vmem>>, vector<1x120xf32>
    %102 = arith.addf %100, %101 : vector<1x120xf32>
    %cst_95 = arith.constant 0.000000e+00 : f32
    %103 = vector.broadcast %cst_95 : f32 to vector<1x120xf32>
    %104 = arith.maximumf %102, %103 : vector<1x120xf32>
    %c0_96 = arith.constant 0 : index
    %c0_97 = arith.constant 0 : index
    %105 = vector.load %arg12[%c0_96, %c0_97] : memref<120x84xf32, #tpu.memory_space<vmem>>, vector<120x84xf32>
    %cst_98 = arith.constant dense<0.000000e+00> : vector<1x84xf32>
    %106 = tpu.matmul %104, %105, %cst_98 {dimension_numbers = #tpu.dot_dimension_numbers<[1], [0], [0], [1], [0, 0, 1, 1], [], []>} : vector<1x120xf32>, vector<120x84xf32>, vector<1x84xf32> -> vector<1x84xf32>
    %c0_99 = arith.constant 0 : index
    %c0_100 = arith.constant 0 : index
    %107 = vector.load %arg13[%c0_99, %c0_100] : memref<1x84xf32, #tpu.memory_space<vmem>>, vector<1x84xf32>
    %108 = arith.addf %106, %107 : vector<1x84xf32>
    %cst_101 = arith.constant 0.000000e+00 : f32
    %109 = vector.broadcast %cst_101 : f32 to vector<1x84xf32>
    %110 = arith.maximumf %108, %109 : vector<1x84xf32>
    %c0_102 = arith.constant 0 : index
    %c0_103 = arith.constant 0 : index
    %111 = vector.load %arg14[%c0_102, %c0_103] : memref<84x10xf32, #tpu.memory_space<vmem>>, vector<84x10xf32>
    %cst_104 = arith.constant dense<0.000000e+00> : vector<1x10xf32>
    %112 = tpu.matmul %110, %111, %cst_104 {dimension_numbers = #tpu.dot_dimension_numbers<[1], [0], [0], [1], [0, 0, 1, 1], [], []>} : vector<1x84xf32>, vector<84x10xf32>, vector<1x10xf32> -> vector<1x10xf32>
    %c0_105 = arith.constant 0 : index
    %c0_106 = arith.constant 0 : index
    %113 = vector.load %arg15[%c0_105, %c0_106] : memref<1x10xf32, #tpu.memory_space<vmem>>, vector<1x10xf32>
    %114 = arith.addf %112, %113 : vector<1x10xf32>
    %c0_107 = arith.constant 0 : index
    %c0_108 = arith.constant 0 : index
    %c0_109 = arith.constant 0 : index
    %115 = vector.load %arg16[%c0_107, %c0_108, %c0_109] : memref<1x1x10xf32, #tpu.memory_space<vmem>>, vector<1x1x10xf32>
    %116 = vector.shape_cast %115 : vector<1x1x10xf32> to vector<1x10xf32>
    %117 = vector.shape_cast %114 : vector<1x10xf32> to vector<1x1x10xf32>
    tpu.vector_store %arg16[%c0_107, %c0_108, %c0_109], %117 {strides = array<i32>} : memref<1x1x10xf32, #tpu.memory_space<vmem>>, vector<1x1x10xf32>,
    return
  }
  func.func @transform_0(%arg0: i32) -> (i32, i32, i32) {
    %c0_i32 = arith.constant 0 : i32
    %c0_i32_0 = arith.constant 0 : i32
    %c0_i32_1 = arith.constant 0 : i32
    return %arg0, %c0_i32, %c0_i32_0 : i32, i32, i32
  }
  func.func @transform_1(%arg0: i32) -> (i32, i32, i32) {
    %c0_i32 = arith.constant 0 : i32
    %c0_i32_0 = arith.constant 0 : i32
    %c0_i32_1 = arith.constant 0 : i32
    %c0_i32_2 = arith.constant 0 : i32
    return %c0_i32, %c0_i32_0, %c0_i32_1 : i32, i32, i32
  }
  func.func @transform_2(%arg0: i32) -> (i32, i32) {
    %c0_i32 = arith.constant 0 : i32
    %c0_i32_0 = arith.constant 0 : i32
    %c0_i32_1 = arith.constant 0 : i32
    return %c0_i32, %c0_i32_0 : i32, i32
  }
  func.func @transform_3(%arg0: i32) -> (i32, i32) {
    %c0_i32 = arith.constant 0 : i32
    %c0_i32_0 = arith.constant 0 : i32
    %c0_i32_1 = arith.constant 0 : i32
    return %c0_i32, %c0_i32_0 : i32, i32
  }
  func.func @transform_4(%arg0: i32) -> (i32, i32) {
    %c0_i32 = arith.constant 0 : i32
    %c0_i32_0 = arith.constant 0 : i32
    %c0_i32_1 = arith.constant 0 : i32
    return %c0_i32, %c0_i32_0 : i32, i32
  }
  func.func @transform_5(%arg0: i32) -> (i32, i32, i32) {
    %c0_i32 = arith.constant 0 : i32
    %c0_i32_0 = arith.constant 0 : i32
    %c0_i32_1 = arith.constant 0 : i32
    %c0_i32_2 = arith.constant 0 : i32
    return %c0_i32, %c0_i32_0, %c0_i32_1 : i32, i32, i32
  }
  func.func @transform_6(%arg0: i32) -> (i32, i32) {
    %c0_i32 = arith.constant 0 : i32
    %c0_i32_0 = arith.constant 0 : i32
    %c0_i32_1 = arith.constant 0 : i32
    return %c0_i32, %c0_i32_0 : i32, i32
  }
  func.func @transform_7(%arg0: i32) -> (i32, i32) {
    %c0_i32 = arith.constant 0 : i32
    %c0_i32_0 = arith.constant 0 : i32
    %c0_i32_1 = arith.constant 0 : i32
    return %c0_i32, %c0_i32_0 : i32, i32
  }
  func.func @transform_8(%arg0: i32) -> (i32, i32) {
    %c0_i32 = arith.constant 0 : i32
    %c0_i32_0 = arith.constant 0 : i32
    %c0_i32_1 = arith.constant 0 : i32
    return %c0_i32, %c0_i32_0 : i32, i32
  }
  func.func @transform_9(%arg0: i32) -> (i32, i32, i32) {
    %c0_i32 = arith.constant 0 : i32
    %c0_i32_0 = arith.constant 0 : i32
    %c0_i32_1 = arith.constant 0 : i32
    %c0_i32_2 = arith.constant 0 : i32
    return %c0_i32, %c0_i32_0, %c0_i32_1 : i32, i32, i32
  }
  func.func @transform_10(%arg0: i32) -> (i32, i32) {
    %c0_i32 = arith.constant 0 : i32
    %c0_i32_0 = arith.constant 0 : i32
    %c0_i32_1 = arith.constant 0 : i32
    return %c0_i32, %c0_i32_0 : i32, i32
  }
  func.func @transform_11(%arg0: i32) -> (i32, i32) {
    %c0_i32 = arith.constant 0 : i32
    %c0_i32_0 = arith.constant 0 : i32
    %c0_i32_1 = arith.constant 0 : i32
    return %c0_i32, %c0_i32_0 : i32, i32
  }
  func.func @transform_12(%arg0: i32) -> (i32, i32) {
    %c0_i32 = arith.constant 0 : i32
    %c0_i32_0 = arith.constant 0 : i32
    %c0_i32_1 = arith.constant 0 : i32
    return %c0_i32, %c0_i32_0 : i32, i32
  }
  func.func @transform_13(%arg0: i32) -> (i32, i32) {
    %c0_i32 = arith.constant 0 : i32
    %c0_i32_0 = arith.constant 0 : i32
    %c0_i32_1 = arith.constant 0 : i32
    return %c0_i32, %c0_i32_0 : i32, i32
  }
  func.func @transform_14(%arg0: i32) -> (i32, i32) {
    %c0_i32 = arith.constant 0 : i32
    %c0_i32_0 = arith.constant 0 : i32
    %c0_i32_1 = arith.constant 0 : i32
    return %c0_i32, %c0_i32_0 : i32, i32
  }
  func.func @transform_15(%arg0: i32) -> (i32, i32, i32) {
    %c0_i32 = arith.constant 0 : i32
    %c0_i32_0 = arith.constant 0 : i32
    %c0_i32_1 = arith.constant 0 : i32
    return %arg0, %c0_i32, %c0_i32_0 : i32, i32, i32
  }
}

</mosaic_0001>

<bundles_post_ra>
// kernel: lenet_forward.1
= control target key start
LH: loop header
LB: loop body
LE: loop exit
PB: predicated region body
PF: predicated region fallthrough
CT: control target
= control target key end

     0   :  { %s3511_s0 = inlined_call_operand.vmem [shape: f32[2,28,28], index: 0, kind: input, shape index: {}]   ;;  %s3512_s1 = inlined_call_operand.vmem [shape: f32[5,28,168], index: 1, kind: input, shape index: {}]   ;;  %s3513_s2 = inlined_call_operand.vmem [shape: f32[1,168], index: 2, kind: input, shape index: {}]   ;;  %s3514_s3 = inlined_call_operand.vmem [shape: f32[14,28], index: 3, kind: input, shape index: {}]   ;;  %s3515_s4 = inlined_call_operand.vmem [shape: f32[168,84], index: 4, kind: input, shape index: {}]   ;;  %s3516_s5 = inlined_call_operand.vmem [shape: f32[5,84,160], index: 5, kind: input, shape index: {}]   ;;  %s3517_s6 = inlined_call_operand.vmem [shape: f32[1,160], index: 6, kind: input, shape index: {}]   ;;  %s3518_s7 = inlined_call_operand.vmem [shape: f32[5,10], index: 7, kind: input, shape index: {}]   ;;  %s3519_s8 = inlined_call_operand.vmem [shape: f32[160,80], index: 8, kind: input, shape index: {}]   ;;  %s3520_s9 = inlined_call_operand.vmem [shape: f32[5,80,120], index: 9, kind: input, shape index: {}]   ;;  %s3521_s10 = inlined_call_operand.vmem [shape: f32[1,120], index: 10, kind: input, shape index: {}]   ;;  %s3522_s11 = inlined_call_operand.vmem [shape: f32[120,84], index: 11, kind: input, shape index: {}]   ;;  %s3523_s12 = inlined_call_operand.vmem [shape: f32[1,84], index: 12, kind: input, shape index: {}]   ;;  %s3524_s13 = inlined_call_operand.vmem [shape: f32[84,10], index: 13, kind: input, shape index: {}]   ;;  %s3525_s14 = inlined_call_operand.vmem [shape: f32[1,10], index: 14, kind: input, shape index: {}]   ;;  %s3526_s15 = inlined_call_operand.hbm [shape: f32[2,1,10], index: 15, kind: output, shape index: {}]  }
   0x1   :  { %3532 = sst [smem:[#allocation11_spill]] %s3511_s0 }
   0x2   :  { %20 = vsyncpa [#allocation4], 0 }
   0x3   :  { %22 = vsyncpa [#allocation4 + $0x1], 0  ;;  %s2469_s18 = smov 0   ;;  %s2471_s19 = smov 0  }
   0x4   :  { %s2473_s20 = smov 0   ;;  %s2475_s21 = smov 0  }
   0x5 LB: > { %3533 = sst [smem:[#allocation6_spill]] %s2374_s18  ;;  %s2490_s22 = sadd.s32 4294967295, %s2386_s21   ;;  %s2386_s21 = sphi %s2475_s21, %s3543_s21   ;;  %s2382_s20 = sphi %s2473_s20, %s3545_s20   ;;  %s2378_s19 = sphi %s2471_s19, %s3547_s19   ;;  %s2374_s18 = sphi %s2469_s18, %s3546_s18  }
   0x6   : > { %3534 = sst [smem:[#allocation7_spill]] %s2382_s20  ;;  %s2010_s23 = sadd.s32 4294967294, %s2386_s21  }
   0x7   : > { %s2494_s24 = sadd.s32 1, %s2386_s21   ;;  %s355_s25 = sadd.s32 1, %s2382_s20 }
   0x8   : > { %3535 = sst [smem:[#allocation8_spill]] %s2494_s24  ;;  %s352_s26 = ssub.s32 %s2386_s21, %s2494_s24 }
   0x9   : > { %p365_p0 = scmp.ne.s32.totalorder %s2382_s20, %s2378_s19  ;;  %p353_p1 = scmp.eq.s32.totalorder %s352_s26, 0 }
   0xa   : > { %p366_p2 = scmp.eq.s32.totalorder %s2490_s22, 1  ;;  %p371_p3 = scmp.ne.s32.totalorder %s2378_s19, %s2374_s18 }
   0xb   : > { %p372_p4 = scmp.eq.s32.totalorder %s2010_s23, 1  ;;  %p2013_p7 = scmp.ge.s32.totalorder %s2386_s21, 1 }
   0xc   : > { %s2505_s27 = scalar_select %p353_p1, %s2382_s20, %s355_s25  }
   0xd   : > { %p2507_p5 = por %p366_p2, %p365_p0  ;;  %p2511_p6 = por %p372_p4, %p371_p3 }
   0xe   : > { %3536 = sst [smem:[#allocation9_spill]] %s2505_s27  ;;  %p440_p8 = scmp.lt.s32.totalorder %s2386_s21, 3 }
   0xf   : > { %s3538_s29 = scalar_select %p2511_p6, 1, 0 }
  0x10   : > { %p441_p9 = pnand %p2013_p7, %p440_p8 }
  0x11   : > { %3539 = sst [smem:[#allocation10_spill]] %s3538_s29  ;;  %p487_p10 = scmp.lt.s32.totalorder (!%p441_p9), %s2490_s22, 1 }
  0x12   : > { %444 = sbr.rel (%p441_p9) target bundleno = 1413 (0x585), region = 80  ;;  %s3540_s0 = sld [smem:[#allocation11_spill]] (!%p441_p9) }
  0x13   : > { %s485_s20 = sand.u32 (!%p441_p9), 1, %s2378_s19   ;;  %s1951_s18 = scalar_lea.hbm (!%p441_p9), %s3526_s15, %s2490_s22 }
  0x14   : > { %s486_s17 = scalar_lea.vmem (!%p441_p9), [#allocation3], %s485_s20  ;;  %s1955_s23 = sshll.u32 (!%p441_p9), %s1951_s18, 4  ;;  %s1956_s23 = int_to_ptr.hbm [resolvable:$true] %s1955_s23 }
  0x15   : > { %s1953_s29 = sshll.u32 (!%p441_p9), %s486_s17, 4  ;;  %s1943_s25 = scalar_lea.sflag (!%p441_p9), [#allocation4], %s485_s20  ;;  %s1954_s29 = int_to_ptr.vmem [resolvable:$true] %s1953_s29 }
  0x16   : > { %s2344_s27 = scalar_lea.hbm (!%p441_p9), %s3526_s15, 2 }
  0x17   : > { %v2022_v0 = vld [vmem:[%s3512_s1 + $0x70] sm:$0xf]  ;;  %vm543_vm0 = vcmask 1043456   ;;  %v2023_v1 = vld [vmem:[%s3512_s1 + $0x78] sm:$0xf]  ;;  %v2020_v2 = vld [vmem:[%s3512_s1 + $0x60] sm:$0xff] }
  0x18   : > { %2024 = vmatpush.msk.msra.mxu0 %vm543_vm0, %v2022_v0  ;;  %2029 = vmatpush.msk.msra.mxu1 %vm543_vm0, %v2023_v1  ;;  %v517_v3 = vld [vmem:[%s3512_s1 + $0x38] sm:$0xf]  ;;  %v2021_v4 = vld [vmem:[%s3512_s1 + $0x68] sm:$0xff]  ;;  %vm492_vm1 = vcmask 228352   ;;  %v2018_v6 = vld [vmem:[%s3512_s1 + $0x50] sm:$0xff]  ;;  %s488_s16 = scalar_select %p487_p10, %s2490_s22, 1 }
  0x19   : > { %v515_v5 = vld [vmem:[%s3512_s1 + $0x28] sm:$0xff]  ;;  %2039 = vmatpush.msk.msra.mxu3 %vm543_vm0, %v517_v3  ;;  %v2019_v7 = vld [vmem:[%s3512_s1 + $0x58] sm:$0xff]  ;;  %v516_v8 = vld [vmem:[%s3512_s1 + $0x30] sm:$0xf]  ;;  %v2388_v10 = vmov 0.0   ;;  %vm504_vm2 = vcmask 224256  }
  0x1a   : > { %563 = vmatpush.msra.mxu0 %v2020_v2  ;;  %592 = vmatpush.msra.mxu1 %v2021_v4  ;;  %v513_v9 = vld [vmem:[%s3512_s1 + $0x18] sm:$0xff]  ;;  %493 = vst.msk [vmem:[#allocation2] sm:$0xff] %vm492_vm1, %v2388_v10  ;;  %v2016_v11 = vld [vmem:[%s3512_s1 + $0x40] sm:$0xff]  ;;  %v2017_v12 = vld [vmem:[%s3512_s1 + $0x48] sm:$0xff]  ;;  %s2279_s30 = sshll.u32 %s488_s16, 5  ;;  %vm1078_vm3 = vcmask 326656  }
  0x1b   : > { %668 = vmatpush.msra.mxu3 %v515_v5  ;;  %2280 = vmatpush.msk.msra.mxu2 %vm543_vm0, %v516_v8  ;;  %v514_v13 = vld [vmem:[%s3512_s1 + $0x20] sm:$0xff]  ;;  %494 = vst.msk [vmem:[#allocation2 + $0x8] sm:$0xff] %vm492_vm1, %v2388_v10  ;;  %v511_v14 = vld [vmem:[%s3512_s1 + $0x8] sm:$0xff]  ;;  %v512_v15 = vld [vmem:[%s3512_s1 + $0x10] sm:$0xff]  ;;  %s491_s26 = scalar_lea.vmem %s3540_s0, %s2279_s30  ;;  %vm1182_vm4 = vcmask 687104   ;;  %vm1178_vm5 = vcmask 1046528  }
  0x1c   : > { %564 = vmatpush.msra.mxu0 %v2018_v6  ;;  %593 = vmatpush.msra.mxu1 %v2019_v7  ;;  %495 = vst.msk [vmem:[#allocation2 + $0x10] sm:$0xff] %vm492_vm1, %v2388_v10  ;;  %v510_v16 = vld [vmem:[%s3512_s1] sm:$0xff]  ;;  %v498_v18 = vld [vmem:[%s491_s26 + $0x8] sm:$0xff]  ;;  %v499_v19 = vld [vmem:[%s491_s26 + $0x10] sm:$0xff]  ;;  %vm1318_vm6 = vcmask 1045504   ;;  %vm1405_vm7 = vcmask 1044480  }
  0x1d   : > { %669 = vmatpush.msra.mxu3 %v513_v9  ;;  %2281 = vmatpush.msra.mxu2 %v514_v13  ;;  %496 = vst.msk [vmem:[#allocation2 + $0x18] sm:$0xff] %vm492_vm1, %v2388_v10  ;;  %v497_v17 = vld [vmem:[%s491_s26] sm:$0xff]  ;;  %v500_v20 = vld [vmem:[%s491_s26 + $0x18] sm:$0xf]  ;;  %v2068_v21 = vld [vmem:[%s3512_s1 + $0xf0] sm:$0xf] }
  0x1e   : > { %565 = vmatpush.msra.mxu0 %v2016_v11  ;;  %594 = vmatpush.msra.mxu1 %v2017_v12  ;;  %501 = vst.msk [vmem:[#allocation2 + $0x2] sm:$0xff] %vm492_vm1, %v497_v17  ;;  %v2050_v22 = vld [vmem:[%s3512_s1 + $0xb0] sm:$0xf]  ;;  %v2048_v23 = vld [vmem:[%s3512_s1 + $0xa0] sm:$0xff]  ;;  %v2069_v25 = vld [vmem:[%s3512_s1 + $0xf8] sm:$0xf] }
  0x1f   : > { %670 = vmatpush.msra.mxu3 %v511_v14  ;;  %2282 = vmatpush.msra.mxu2 %v512_v15  ;;  %502 = vst.msk [vmem:[#allocation2 + $0xa] sm:$0xff] %vm492_vm1, %v498_v18  ;;  %v2066_v24 = vld [vmem:[%s3512_s1 + $0xe0] sm:$0xff]  ;;  %v2046_v26 = vld [vmem:[%s3512_s1 + $0x90] sm:$0xff]  ;;  %v2067_v27 = vld [vmem:[%s3512_s1 + $0xe8] sm:$0xff]  ;;  %vm1574_vm8 = vcmask 1041408   ;;  %vm1570_vm9 = vcmask 80896  }
  0x20   : > { %2034 = vmatpush.msk.msrb.mxu1 %vm543_vm0, %v516_v8  ;;  %503 = vst.msk [vmem:[#allocation2 + $0x12] sm:$0xff] %vm492_vm1, %v499_v19  ;;  %2052 = vmatpush.msk.msrb.mxu0 %vm543_vm0, %v2050_v22  ;;  %v2064_v28 = vld [vmem:[%s3512_s1 + $0xd0] sm:$0xff]  ;;  %v2062_v29 = vld [vmem:[%s3512_s1 + $0xc0] sm:$0xff]  ;;  %v2051_v34 = vld [vmem:[%s3512_s1 + $0xb8] sm:$0xf]  ;;  %vm1641_vm10 = vcmask 261120  }
  0x21   : > { %2283 = vmatpush.msra.mxu2 %v510_v16  ;;  %505 = vst.msk [vmem:[#allocation2 + $0x1a] sm:$0xf] %vm504_vm2, %v500_v20  ;;  %2075 = vmatpush.msk.msrb.mxu3 %vm543_vm0, %v2069_v25  ;;  %v2044_v32 = vld [vmem:[%s3512_s1 + $0x80] sm:$0xff]  ;;  %v2065_v35 = vld [vmem:[%s3512_s1 + $0xd8] sm:$0xff]  ;;  %v2049_v36 = vld [vmem:[%s3512_s1 + $0xa8] sm:$0xff]  ;;  %vm1708_vm11 = vcmask 654336  }
  0x22   : > { %639 = vmatpush.msrb.mxu1 %v514_v13  ;;  %728 = vmatpush.msrb.mxu0 %v2048_v23  ;;  %v2063_v37 = vld [vmem:[%s3512_s1 + $0xc8] sm:$0xff]  ;;  %v2047_v38 = vld [vmem:[%s3512_s1 + $0x98] sm:$0xff]  ;;  %v2086_v46 = vld [vmem:[%s3512_s1 + $0x130] sm:$0xf]  ;;  %vm1877_vm12 = vcmask 982016   ;;  %vm1940_vm13 = vcmask 73728  }
  0x23   : > { %2070 = vmatpush.msk.msrb.mxu2 %vm543_vm0, %v2068_v21  ;;  %854 = vmatpush.msrb.mxu3 %v2067_v27  ;;  %v2045_v41 = vld [vmem:[%s3512_s1 + $0x88] sm:$0xff]  ;;  %v2084_v47 = vld [vmem:[%s3512_s1 + $0x120] sm:$0xff]  ;;  %v2082_v48 = vld [vmem:[%s3512_s1 + $0x110] sm:$0xff]  ;;  %s2338_s26 = sshra.s32 %s1956_s23, 4  ;;  %s2339_s26 = int_to_ptr.hbm [resolvable:$true] %s2338_s26 }
  0x24   : > { %640 = vmatpush.msrb.mxu1 %v512_v15  ;;  %729 = vmatpush.msrb.mxu0 %v2046_v26  ;;  %v2080_v51 = vld [vmem:[%s3512_s1 + $0x100] sm:$0xff]  ;;  %v2087_v52 = vld [vmem:[%s3512_s1 + $0x138] sm:$0xf]  ;;  %v2085_v53 = vld [vmem:[%s3512_s1 + $0x128] sm:$0xff]  ;;  %s2340_s0 = scalar_lea.hbm %s2339_s26, 1  ;;  %p2345_p0 = scmp.lt.s32.totalorder %s2339_s26, %s3526_s15 }
  0x25   : > { %825 = vmatpush.msrb.mxu2 %v2066_v24  ;;  %v518_v30 = vld [vmem:[#allocation2 + $0x1] sm:$0xff]  ;;  %855 = vmatpush.msrb.mxu3 %v2065_v35  ;;  %v2083_v54 = vld [vmem:[%s3512_s1 + $0x118] sm:$0xff]  ;;  %p2341_p11 = scmp.ne.s32.totalorder %s2339_s26, %s2340_s0  ;;  %p2346_p1 = scmp.lt.s32.totalorder %s2344_s27, %s2340_s0 }
  0x26   : > { %v506_v31 = vld [vmem:[#allocation2] sm:$0xff]  ;;  %641 = vmatpush.msrb.mxu1 %v510_v16  ;;  %2025 = vmatmul.msk.f32.vlgmr.msra.gmra.mxu0 %vm492_vm1, %v518_v30  ;;  %v507_v33 = vld [vmem:[#allocation2 + $0x8] sm:$0xff] }
  0x27   : > { %826 = vmatpush.msrb.mxu2 %v2064_v28  ;;  %2030 = vmatmul.msk.f32.vlgmr.msra.gmra.mxu1 %vm492_vm1, %v518_v30  ;;  %v519_v39 = vld [vmem:[#allocation2 + $0x9] sm:$0xff]  ;;  %v520_v42 = vld [vmem:[#allocation2 + $0x11] sm:$0xff]  ;;  %p2342_p12 = pnand %p2341_p11, %p2507_p5  ;;  %p2347_p2 = por %p2346_p1, %p2345_p0 }
  0x28   : > { %2040 = vmatmul.msk.f32.vlgmr.msra.gmra.mxu3 %vm492_vm1, %v506_v31  ;;  %2036 = vmatmul.msk.f32.vlgmr.msra.gmra.mxu2 %vm492_vm1, %v507_v33  ;;  %v508_v40 = vld [vmem:[#allocation2 + $0x10] sm:$0xff]  ;;  %v509_v43 = vld [vmem:[#allocation2 + $0x18] sm:$0xf]  ;;  %v781_v45 = vld [vmem:[#allocation2 + $0x3] sm:$0xff] }
  0x29   : > { %827 = vmatpush.msrb.mxu2 %v2062_v29  ;;  %730 = vmatpush.msrb.mxu0 %v2044_v32  ;;  %v521_v44 = vld [vmem:[#allocation2 + $0x19] sm:$0xf]  ;;  %v684_v49 = vld [vmem:[#allocation2 + $0x2] sm:$0xff]  ;;  %v782_v50 = vld [vmem:[#allocation2 + $0xb] sm:$0xff]  ;;  %p2343_p13 = pneg %p2342_p12 }
  0x2a   : > { %2057 = vmatpush.msk.msra.mxu1 %vm543_vm0, %v2051_v34  ;;  %856 = vmatpush.msrb.mxu3 %v2063_v37  ;;  %v685_v55 = vld [vmem:[#allocation2 + $0xa] sm:$0xff]  ;;  %v783_v56 = vld [vmem:[#allocation2 + $0x13] sm:$0xff]  ;;  %v784_v59 = vld [vmem:[#allocation2 + $0x1b] sm:$0xf] }
  0x2b   : > { %2088 = vmatpush.msk.msra.mxu0 %vm543_vm0, %v2086_v46  ;;  %v2081_v57 = vld [vmem:[%s3512_s1 + $0x108] sm:$0xff]  ;;  %v686_v58 = vld [vmem:[#allocation2 + $0x12] sm:$0xff]  ;;  %v687_v60 = vld [vmem:[#allocation2 + $0x1a] sm:$0xf]  ;;  %p2348_p3 = pnand %p2347_p2, %p2343_p13 }
  0x2c   : > { %757 = vmatpush.msra.mxu1 %v2049_v36  ;;  %v878_v61 = vld [vmem:[#allocation2 + $0x4] sm:$0xff]  ;;  %v879_v62 = vld [vmem:[#allocation2 + $0xc] sm:$0xff]  ;;  %v880_v63 = vld [vmem:[#allocation2 + $0x14] sm:$0xff] }
  0x2d   : > { %922 = vmatpush.msra.mxu0 %v2084_v47  ;;  %v881_v0 = vld [vmem:[#allocation2 + $0x1c] sm:$0xf]  ;;  %v975_v46 = vld [vmem:[%s3513_s2] sm:$0x3] }
  0x2e   : > { %758 = vmatpush.msra.mxu1 %v2047_v38  ;;  %2026 = vmatmul.msk.f32.gmra.mxu0 %vm492_vm1, %v519_v39  ;;  %v1072_v47 = vld [vmem:[%s3515_s4 + $0x78] sm:$0xff] }
  0x2f   : > { %2031 = vmatmul.msk.f32.gmra.mxu1 %vm492_vm1, %v519_v39  ;;  %923 = vmatpush.msra.mxu0 %v2082_v48  ;;  %v1071_v48 = vld [vmem:[%s3515_s4 + $0x70] sm:$0xff] }
  0x30   : > { %2041 = vmatmul.msk.f32.gmra.mxu3 %vm492_vm1, %v507_v33  ;;  %2037 = vmatmul.msk.f32.gmra.mxu2 %vm492_vm1, %v508_v40 }
  0x31   : > { %759 = vmatpush.msra.mxu1 %v2045_v41  ;;  %924 = vmatpush.msra.mxu0 %v2080_v51 }
  0x36   : > { %2027 = vmatmul.msk.f32.gmra.mxu0 %vm492_vm1, %v520_v42 }
  0x37   : > { %2032 = vmatmul.msk.f32.gmra.mxu1 %vm492_vm1, %v520_v42 }
  0x38   : > { %2042 = vmatmul.msk.f32.gmra.mxu3 %vm492_vm1, %v508_v40  ;;  %2038 = vmatmul.msk.f32.gmra.mxu2 %vm492_vm1, %v509_v43 }
  0x3e   : > { %2028 = vmatmul.msk.f32.gmra.mxu0 %vm492_vm1, %v521_v44 }
  0x3f   : > { %2033 = vmatmul.msk.f32.gmra.mxu1 %vm492_vm1, %v521_v44 }
  0x40   : > { %2043 = vmatmul.msk.f32.gmra.mxu3 %vm492_vm1, %v509_v43  ;;  %2071 = vmatmul.msk.f32.vlgmr.msrb.gmra.mxu2 %vm492_vm1, %v781_v45 }
  0x46   : > { %2053 = vmatmul.msk.f32.vlgmr.msrb.gmra.mxu0 %vm492_vm1, %v684_v49 }
  0x47   : > { %2035 = vmatmul.msk.f32.vlgmr.msrb.gmra.mxu1 %vm492_vm1, %v506_v31  ;;  %1085 = vmatpush.msrb.mxu0 %v1072_v47  ;;  %v1073_v47 = vld [vmem:[%s3515_s4 + $0x80] sm:$0xff] }
  0x48   : > { %2072 = vmatmul.msk.f32.gmra.mxu2 %vm492_vm1, %v782_v50  ;;  %2076 = vmatmul.msk.f32.vlgmr.msrb.gmra.mxu3 %vm492_vm1, %v781_v45 }
  0x49   : > { %2093 = vmatpush.msk.msrb.mxu1 %vm543_vm0, %v2087_v52  ;;  %1086 = vmatpush.msrb.mxu0 %v1071_v48  ;;  %v1059_v48 = vld [vmem:[%s3515_s4 + $0x10] sm:$0xff] }
  0x4b   : > { %951 = vmatpush.msrb.mxu1 %v2085_v53 }
  0x4d   : > { %952 = vmatpush.msrb.mxu1 %v2083_v54 }
  0x4e   : > { %2054 = vmatmul.msk.f32.gmra.mxu0 %vm492_vm1, %v685_v55 }
  0x4f   : > { %2058 = vmatmul.msk.f32.vlgmr.msra.gmra.mxu1 %vm492_vm1, %v684_v49 }
  0x50   : > { %2073 = vmatmul.msk.f32.gmra.mxu2 %vm492_vm1, %v783_v56  ;;  %2077 = vmatmul.msk.f32.gmra.mxu3 %vm492_vm1, %v782_v50 }
  0x51   : > { %953 = vmatpush.msrb.mxu1 %v2081_v57 }
  0x56   : > { %2055 = vmatmul.msk.f32.gmra.mxu0 %vm492_vm1, %v686_v58 }
  0x57   : > { %2059 = vmatmul.msk.f32.gmra.mxu1 %vm492_vm1, %v685_v55  ;;  %v977_v55 = vperm.slane %v975_v46, 0 }
  0x58   : > { %2074 = vmatmul.msk.f32.gmra.mxu2 %vm492_vm1, %v784_v59  ;;  %2078 = vmatmul.msk.f32.gmra.mxu3 %vm492_vm1, %v783_v56 }
  0x5e   : > { %2056 = vmatmul.msk.f32.gmra.mxu0 %vm492_vm1, %v687_v60 }
  0x5f   : > { %2060 = vmatmul.msk.f32.gmra.mxu1 %vm492_vm1, %v686_v58  ;;  %v1070_v58 = vld [vmem:[%s3515_s4 + $0x68] sm:$0xff] }
  0x60   : > { %2079 = vmatmul.msk.f32.gmra.mxu3 %vm492_vm1, %v784_v59  ;;  %1087 = vmatpush.msrb.mxu0 %v1070_v58  ;;  %v2122_v58 = vld [vmem:[%s3516_s5 + $0x130] sm:$0xff] }
  0x66   : > { %2089 = vmatmul.msk.f32.vlgmr.msra.gmra.mxu0 %vm492_vm1, %v878_v61 }
  0x67   : > { %2061 = vmatmul.msk.f32.gmra.mxu1 %vm492_vm1, %v687_v60 }
  0x6e   : > { %2090 = vmatmul.msk.f32.gmra.mxu0 %vm492_vm1, %v879_v62 }
  0x6f   : > { %2094 = vmatmul.msk.f32.vlgmr.msrb.gmra.mxu1 %vm492_vm1, %v878_v61 }
  0x76   : > { %2091 = vmatmul.msk.f32.gmra.mxu0 %vm492_vm1, %v880_v63 }
  0x77   : > { %2095 = vmatmul.msk.f32.gmra.mxu1 %vm492_vm1, %v879_v62 }
  0x7e   : > { %2092 = vmatmul.msk.f32.gmra.mxu0 %vm492_vm1, %v881_v0 }
  0x7f   : > { %2096 = vmatmul.msk.f32.gmra.mxu1 %vm492_vm1, %v880_v63 }
  0x87   : > { %2097 = vmatmul.msk.f32.gmra.mxu1 %vm492_vm1, %v881_v0 }
  0xa3   : > { %v567_v1 = vpop.f32.mrf.mxu0 }
  0xa4   : > { %v2700_v2 = vpop.f32.mrf.mxu1 }
  0xab   : > { %v570_v3 = vpop.f32.mrf.mxu0  ;;  %v672_v7 = vpop.f32.mrf.mxu3 }
  0xac   : > { %v599_v4 = vpop.f32.mrf.mxu1  ;;  %v646_v8 = vpop.f32.mrf.mxu2  ;;  %v673_v63 = vadd.f32 %v672_v7, %v2700_v2  ;;  %v1067_v7 = vld [vmem:[%s3515_s4 + $0x50] sm:$0xff] }
  0xad   : > { %v647_v36 = vadd.f32 %v646_v8, %v570_v3 }
  0xb3   : > { %v573_v5 = vpop.f32.mrf.mxu0  ;;  %v675_v13 = vpop.f32.mrf.mxu3 }
  0xb4   : > { %v602_v6 = vpop.f32.mrf.mxu1  ;;  %v649_v14 = vpop.f32.mrf.mxu2  ;;  %v676_v53 = vadd.f32 %v675_v13, %v599_v4 }
  0xb5   : > { %v650_v33 = vadd.f32 %v649_v14, %v573_v5 }
  0xbb   : > { %v576_v9 = vpop.f32.mrf.mxu0  ;;  %v678_v17 = vpop.f32.mrf.mxu3 }
  0xbc   : > { %v605_v10 = vpop.f32.mrf.mxu1  ;;  %v652_v18 = vpop.f32.mrf.mxu2  ;;  %v679_v49 = vadd.f32 %v678_v17, %v602_v6 }
  0xbd   : > { %v653_v37 = vadd.f32 %v652_v18, %v576_v9  ;;  %v1068_v9 = vld [vmem:[%s3515_s4 + $0x58] sm:$0xff] }
  0xc3   : > { %v732_v12 = vpop.f32.mrf.mxu0  ;;  %v681_v21 = vpop.f32.mrf.mxu3 }
  0xc4   : > { %v643_v11 = vpop.f32.mrf.mxu1  ;;  %v829_v22 = vpop.f32.mrf.mxu2  ;;  %v682_v54 = vadd.f32 %v681_v21, %v605_v10 }
  0xc5   : > { %v644_v38 = vadd.f32 %v643_v11, %v567_v1  ;;  %v1069_v1 = vld [vmem:[%s3515_s4 + $0x60] sm:$0xff] }
  0xc6   : > { %1088 = vmatpush.msrb.mxu0 %v1069_v1  ;;  %v1143_v1 = vld [vmem:[%s3516_s5 + $0x60] sm:$0xff] }
  0xc7   : > { %v773_v44 = vadd.f32 %v732_v12, %v644_v38  ;;  %v1076_v38 = vld [vmem:[%s3515_s4 + $0x98] sm:$0xff] }
  0xc8   : > { %1089 = vmatpush.msrb.mxu0 %v1068_v9  ;;  %v2116_v9 = vld [vmem:[%s3516_s5 + $0x100] sm:$0xff] }
  0xc9   : > { %v870_v59 = vadd.f32 %v829_v22, %v773_v44  ;;  %v1074_v44 = vld [vmem:[%s3515_s4 + $0x88] sm:$0xff] }
  0xca   : > { %1090 = vmatpush.msrb.mxu0 %v1067_v7  ;;  %v1137_v7 = vld [vmem:[%s3516_s5 + $0x30] sm:$0xff] }
  0xcb   : > { %v735_v15 = vpop.f32.mrf.mxu0  ;;  %v2702_v25 = vpop.f32.mrf.mxu3 }
  0xcc   : > { %v761_v16 = vpop.f32.mrf.mxu1  ;;  %v832_v26 = vpop.f32.mrf.mxu2  ;;  %v775_v41 = vadd.f32 %v735_v15, %v647_v36 }
  0xcd   : > { %v774_v10 = vadd.f32 %v761_v16, %v673_v63  ;;  %v1066_v16 = vld [vmem:[%s3515_s4 + $0x48] sm:$0xff] }
  0xce   : > { %v872_v50 = vadd.f32 %v832_v26, %v775_v41  ;;  %v1065_v26 = vld [vmem:[%s3515_s4 + $0x40] sm:$0xff]  ;;  %1091 = vmatpush.msrb.mxu0 %v1066_v16  ;;  %v1075_v41 = vld [vmem:[%s3515_s4 + $0x90] sm:$0xff]  ;;  %v2121_v63 = vld [vmem:[%s3516_s5 + $0x128] sm:$0xff] }
  0xcf   : > { %v871_v21 = vadd.f32 %v2702_v25, %v774_v10  ;;  %v1064_v25 = vld [vmem:[%s3515_s4 + $0x38] sm:$0xff]  ;;  %v2117_v10 = vld [vmem:[%s3516_s5 + $0x108] sm:$0xff]  ;;  %v1133_v16 = vld [vmem:[%s3516_s5 + $0x10] sm:$0xff] }
  0xd0   : > { %1092 = vmatpush.msrb.mxu0 %v1065_v26 }
  0xd2   : > { %1093 = vmatpush.msrb.mxu0 %v1064_v25  ;;  %v2109_v25 = vld [vmem:[%s3516_s5 + $0xc8] sm:$0xff] }
  0xd3   : > { %v738_v19 = vpop.f32.mrf.mxu0  ;;  %v861_v29 = vpop.f32.mrf.mxu3 }
  0xd4   : > { %v764_v20 = vpop.f32.mrf.mxu1  ;;  %v835_v32 = vpop.f32.mrf.mxu2  ;;  %v777_v39 = vadd.f32 %v738_v19, %v650_v33  ;;  %v978_v19 = vperm.slane %v975_v46, 1  ;;  %v1060_v46 = vld [vmem:[%s3515_s4 + $0x18] sm:$0xff] }
  0xd5   : > { %v776_v0 = vadd.f32 %v764_v20, %v676_v53  ;;  %v2126_v53 = vld [vmem:[%s3516_s5 + $0x150] sm:$0xf] }
  0xd6   : > { %v874_v45 = vadd.f32 %v835_v32, %v777_v39  ;;  %v1062_v39 = vld [vmem:[%s3515_s4 + $0x28] sm:$0xff] }
  0xd7   : > { %v873_v2 = vadd.f32 %v861_v29, %v776_v0  ;;  %v2158_v0 = vld [vmem:[%s3516_s5 + $0x1f0] sm:$0xff] }
  0xdb   : > { %v741_v23 = vpop.f32.mrf.mxu0  ;;  %v864_v40 = vpop.f32.mrf.mxu3 }
  0xdc   : > { %v767_v24 = vpop.f32.mrf.mxu1  ;;  %v779_v42 = vadd.f32 %v741_v23, %v653_v37  ;;  %v838_v43 = vpop.f32.mrf.mxu2 }
  0xdd   : > { %v778_v60 = vadd.f32 %v767_v24, %v679_v49  ;;  %v1058_v49 = vld [vmem:[%s3515_s4 + $0x8] sm:$0xff] }
  0xde   : > { %v876_v51 = vadd.f32 %v838_v43, %v779_v42  ;;  %v1061_v42 = vld [vmem:[%s3515_s4 + $0x20] sm:$0xff] }
  0xdf   : > { %v875_v11 = vadd.f32 %v864_v40, %v778_v60  ;;  %v1145_v60 = vld [vmem:[%s3516_s5 + $0x70] sm:$0xff] }
  0xe3   : > { %v926_v28 = vpop.f32.mrf.mxu0  ;;  %v867_v8 = vpop.f32.mrf.mxu3 }
  0xe4   : > { %v770_v27 = vpop.f32.mrf.mxu1  ;;  %v967_v4 = vadd.f32 %v926_v28, %v870_v59  ;;  %v2123_v59 = vld [vmem:[%s3516_s5 + $0x138] sm:$0xff] }
  0xe5   : > { %v780_v3 = vadd.f32 %v770_v27, %v682_v54  ;;  %v2127_v54 = vld [vmem:[%s3516_s5 + $0x158] sm:$0xf] }
  0xe6   : > { %v981_v14 = vadd.f32 %v977_v55, %v967_v4  ;;  %2131 = vmatpush.msk.msra.mxu1 %vm543_vm0, %v2127_v54  ;;  %v2118_v4 = vld [vmem:[%s3516_s5 + $0x110] sm:$0xff]  ;;  %v2174_v54 = vld [vmem:[%s3516_s5 + $0x240] sm:$0xff] }
  0xe7   : > { %v877_v15 = vadd.f32 %v867_v8, %v780_v3  ;;  %v2156_v3 = vld [vmem:[%s3516_s5 + $0x1e0] sm:$0xff]  ;;  %v2154_v8 = vld [vmem:[%s3516_s5 + $0x1d0] sm:$0xff] }
  0xe8   : > { %v989_v27 = vmax.f32 %v981_v14, 0.0  ;;  %v2150_v14 = vld [vmem:[%s3516_s5 + $0x1b0] sm:$0xff] }
  0xeb   : > { %v929_v30 = vpop.f32.mrf.mxu0 }
  0xec   : > { %v2704_v31 = vpop.f32.mrf.mxu1  ;;  %v969_v61 = vadd.f32 %v929_v30, %v872_v50  ;;  %v1057_v50 = vld [vmem:[%s3515_s4] sm:$0xff] }
  0xed   : > { %v968_v28 = vadd.f32 %v2704_v31, %v871_v21  ;;  %v1077_v31 = vld [vmem:[%s3515_s4 + $0xa0] sm:$0xff]  ;;  %v2111_v21 = vld [vmem:[%s3516_s5 + $0xd8] sm:$0xff] }
  0xee   : > { %v983_v12 = vadd.f32 %v977_v55, %v969_v61  ;;  %v2160_v61 = vld [vmem:[%s3516_s5 + $0x200] sm:$0xf] }
  0xef   : > { %v982_v36 = vadd.f32 %v978_v19, %v968_v28  ;;  %v2148_v28 = vld [vmem:[%s3516_s5 + $0x1a0] sm:$0xff] }
  0xf0   : > { %v991_v22 = vmax.f32 %v983_v12, 0.0  ;;  %v2152_v12 = vld [vmem:[%s3516_s5 + $0x1c0] sm:$0xff] }
  0xf1   : > { %v990_v43 = vmax.f32 %v982_v36, 0.0  ;;  %v2144_v36 = vld [vmem:[%s3516_s5 + $0x180] sm:$0xff] }
  0xf3   : > { %v932_v34 = vpop.f32.mrf.mxu0 }
  0xf4   : > { %v958_v35 = vpop.f32.mrf.mxu1  ;;  %v971_v52 = vadd.f32 %v932_v34, %v874_v45  ;;  %v997_v34 = vld [vmem:[%s3514_s3] sm:$0xff]  ;;  %v998_v45 = vld [vmem:[%s3514_s3 + $0x8] sm:$0x3f] }
  0xf5   : > { %v970_v23 = vadd.f32 %v958_v35, %v873_v2  ;;  %v1063_v35 = vld [vmem:[%s3515_s4 + $0x30] sm:$0xff]  ;;  %v2115_v2 = vld [vmem:[%s3516_s5 + $0xf8] sm:$0xff] }
  0xf6   : > { %v985_v5 = vadd.f32 %v977_v55, %v971_v52  ;;  %1094 = vmatpush.msrb.mxu0 %v1063_v35  ;;  %v1149_v52 = vld [vmem:[%s3516_s5 + $0x90] sm:$0xff]  ;;  %v1152_v35 = vld [vmem:[%s3516_s5 + $0xa8] sm:$0xf] }
  0xf7   : > { %v984_v32 = vadd.f32 %v978_v19, %v970_v23  ;;  %v2188_v23 = vld [vmem:[%s3516_s5 + $0x2b0] sm:$0xf] }
  0xf8   : > { %v993_v17 = vmax.f32 %v985_v5, 0.0  ;;  %1095 = vmatpush.msrb.mxu0 %v1062_v39  ;;  %v2119_v5 = vld [vmem:[%s3516_s5 + $0x118] sm:$0xff] }
  0xf9   : > { %v992_v40 = vmax.f32 %v984_v32, 0.0  ;;  %v2146_v32 = vld [vmem:[%s3516_s5 + $0x190] sm:$0xff]  ;;  %v1150_v39 = vld [vmem:[%s3516_s5 + $0x98] sm:$0xff] }
  0xfa   : > { %1096 = vmatpush.msrb.mxu0 %v1061_v42  ;;  %v2180_v42 = vld [vmem:[%s3516_s5 + $0x270] sm:$0xff] }
  0xfb   : > { %v935_v56 = vpop.f32.mrf.mxu0 }
  0xfc   : > { %v961_v57 = vpop.f32.mrf.mxu1  ;;  %v973_v62 = vadd.f32 %v935_v56, %v876_v51  ;;  %1097 = vmatpush.msrb.mxu0 %v1060_v46  ;;  %v1151_v51 = vld [vmem:[%s3516_s5 + $0xa0] sm:$0xf] }
  0xfd   : > { %v972_v18 = vadd.f32 %v961_v57, %v875_v11  ;;  %v2124_v56 = vld [vmem:[%s3516_s5 + $0x140] sm:$0xff]  ;;  %v2125_v57 = vld [vmem:[%s3516_s5 + $0x148] sm:$0xff] }
  0xfe   : > { %v987_v6 = vadd.f32 %v977_v55, %v973_v62  ;;  %1098 = vmatpush.msrb.mxu0 %v1059_v48  ;;  %v1147_v55 = vld [vmem:[%s3516_s5 + $0x80] sm:$0xff]  ;;  %1222 = vmatpush.msra.mxu1 %v2125_v57  ;;  %v1146_v48 = vld [vmem:[%s3516_s5 + $0x78] sm:$0xff] }
  0xff   : > { %v986_v29 = vadd.f32 %v978_v19, %v972_v18  ;;  %v2120_v62 = vld [vmem:[%s3516_s5 + $0x120] sm:$0xff]  ;;  %v2113_v18 = vld [vmem:[%s3516_s5 + $0xe8] sm:$0xff]  ;;  %v2151_v57 = vld [vmem:[%s3516_s5 + $0x1b8] sm:$0xff] }
 0x100   : > { %v995_v13 = vmax.f32 %v987_v6, 0.0  ;;  %1099 = vmatpush.msrb.mxu0 %v1058_v49  ;;  %1223 = vmatpush.msra.mxu1 %v2123_v59  ;;  %v1141_v6 = vld [vmem:[%s3516_s5 + $0x50] sm:$0xff]  ;;  %v1139_v11 = vld [vmem:[%s3516_s5 + $0x40] sm:$0xff]  ;;  %v2155_v49 = vld [vmem:[%s3516_s5 + $0x1d8] sm:$0xff] }
 0x101   : > { %v994_v37 = vmax.f32 %v986_v29, 0.0  ;;  %v2186_v29 = vld [vmem:[%s3516_s5 + $0x2a0] sm:$0xff]  ;;  %v2210_v59 = vld [vmem:[%s3516_s5 + $0x330] sm:$0xff] }
 0x102   : > { %2098 = vmatpush.msk.msra.mxu2 %vm543_vm0, %v995_v13  ;;  %1100 = vmatpush.msrb.mxu0 %v1057_v50  ;;  %v2114_v13 = vld [vmem:[%s3516_s5 + $0xf0] sm:$0xff]  ;;  %v2178_v46 = vld [vmem:[%s3516_s5 + $0x260] sm:$0xff] }
 0x103   : > { %1224 = vmatpush.msra.mxu1 %v2121_v63  ;;  %v2176_v50 = vld [vmem:[%s3516_s5 + $0x250] sm:$0xff]  ;;  %v2208_v63 = vld [vmem:[%s3516_s5 + $0x320] sm:$0xff] }
 0x104   : > { %v964_v20 = vpop.f32.mrf.mxu1  ;;  %1024 = vmatpush.msra.mxu2 %v993_v17  ;;  %2162 = vmatpush.msk.msra.mxu0 %vm543_vm0, %v2160_v61  ;;  %v1135_v17 = vld [vmem:[%s3516_s5 + $0x20] sm:$0xff]  ;;  %v2149_v61 = vld [vmem:[%s3516_s5 + $0x1a8] sm:$0xff] }
 0x105   : > { %v974_v24 = vadd.f32 %v964_v20, %v877_v15  ;;  %1225 = vmatpush.msra.mxu1 %v2119_v5  ;;  %v2112_v15 = vld [vmem:[%s3516_s5 + $0xe0] sm:$0xff]  ;;  %v2110_v20 = vld [vmem:[%s3516_s5 + $0xd0] sm:$0xff]  ;;  %v1136_v5 = vld [vmem:[%s3516_s5 + $0x28] sm:$0xff] }
 0x106   : > { %1025 = vmatpush.msra.mxu2 %v991_v22  ;;  %1338 = vmatpush.msra.mxu0 %v2158_v0  ;;  %v1131_v22 = vld [vmem:[%s3516_s5] sm:$0xff]  ;;  %v1138_v0 = vld [vmem:[%s3516_s5 + $0x38] sm:$0xff] }
 0x107   : > { %v988_v30 = vadd.f32 %v978_v19, %v974_v24  ;;  %1226 = vmatpush.msra.mxu1 %v2117_v10  ;;  %v2143_v10 = vld [vmem:[%s3516_s5 + $0x178] sm:$0xff] }
 0x108   : > { %1026 = vmatpush.msra.mxu2 %v989_v27  ;;  %1339 = vmatpush.msra.mxu0 %v2156_v3  ;;  %v2168_v3 = vld [vmem:[%s3516_s5 + $0x210] sm:$0xff] }
 0x109   : > { %v996_v33 = vmax.f32 %v988_v30, 0.0  ;;  %2099 = vmatmul.msk.f32.vlgmr.msra.gmra.mxu2 %vm492_vm1, %v997_v34  ;;  %1227 = vmatpush.msra.mxu1 %v2115_v2  ;;  %v2108_v30 = vld [vmem:[%s3516_s5 + $0xc0] sm:$0xff] }
 0x10a   : > { %1119 = vmatpush.msrb.mxu2 %v1077_v31  ;;  %1340 = vmatpush.msra.mxu0 %v2154_v8  ;;  %v2107_v31 = vld [vmem:[%s3516_s5 + $0xb8] sm:$0xff]  ;;  %v2204_v8 = vld [vmem:[%s3516_s5 + $0x300] sm:$0xff] }
 0x10b   : > { %2101 = vmatpush.msk.msra.mxu3 %vm543_vm0, %v996_v33  ;;  %1228 = vmatpush.msra.mxu1 %v2113_v18  ;;  %v2184_v33 = vld [vmem:[%s3516_s5 + $0x290] sm:$0xff]  ;;  %v2200_v2 = vld [vmem:[%s3516_s5 + $0x2e0] sm:$0xff] }
 0x10c   : > { %1120 = vmatpush.msrb.mxu2 %v1076_v38  ;;  %1341 = vmatpush.msra.mxu0 %v2152_v12  ;;  %v2182_v38 = vld [vmem:[%s3516_s5 + $0x280] sm:$0xff]  ;;  %v1132_v12 = vld [vmem:[%s3516_s5 + $0x8] sm:$0xff] }
 0x10d   : > { %1047 = vmatpush.msra.mxu3 %v994_v37  ;;  %1229 = vmatpush.msra.mxu1 %v2111_v21  ;;  %v2161_v37 = vld [vmem:[%s3516_s5 + $0x208] sm:$0xf] }
 0x10e   : > { %1121 = vmatpush.msrb.mxu2 %v1075_v41  ;;  %1342 = vmatpush.msra.mxu0 %v2150_v14  ;;  %v2159_v41 = vld [vmem:[%s3516_s5 + $0x1f8] sm:$0xff] }
 0x10f   : > { %1048 = vmatpush.msra.mxu3 %v992_v40  ;;  %1230 = vmatpush.msra.mxu1 %v2109_v25  ;;  %v2142_v40 = vld [vmem:[%s3516_s5 + $0x170] sm:$0xff]  ;;  %v2187_v25 = vld [vmem:[%s3516_s5 + $0x2a8] sm:$0xff] }
 0x110   : > { %1122 = vmatpush.msrb.mxu2 %v1074_v44  ;;  %1343 = vmatpush.msra.mxu0 %v2148_v28  ;;  %v2140_v44 = vld [vmem:[%s3516_s5 + $0x160] sm:$0xff] }
 0x111   : > { %1049 = vmatpush.msra.mxu3 %v990_v43  ;;  %2100 = vmatmul.msk.f32.gmra.mxu2 %vm492_vm1, %v998_v45  ;;  %v1148_v43 = vld [vmem:[%s3516_s5 + $0x88] sm:$0xff] }
 0x112   : > { %2102 = vmatmul.msk.f32.vlgmr.msra.gmra.mxu3 %vm492_vm1, %v997_v34  ;;  %1123 = vmatpush.msrb.mxu2 %v1073_v47  ;;  %v2106_v34 = vld [vmem:[%s3516_s5 + $0xb0] sm:$0xff]  ;;  %v2216_v47 = vld [vmem:[%s3516_s5 + $0x360] sm:$0xf] }
 0x113   : > { %2128 = vmatpush.msk.msrb.mxu3 %vm543_vm0, %v2126_v53  ;;  %1344 = vmatpush.msra.mxu0 %v2146_v32  ;;  %v2153_v53 = vld [vmem:[%s3516_s5 + $0x1c8] sm:$0xff]  ;;  %v2215_v32 = vld [vmem:[%s3516_s5 + $0x358] sm:$0xff] }
 0x114   : > { %2134 = vmatpush.msk.msra.mxu2 %vm543_vm0, %v1151_v51  ;;  %1231 = vmatpush.msra.mxu1 %v2107_v31  ;;  %v2214_v51 = vld [vmem:[%s3516_s5 + $0x350] sm:$0xff]  ;;  %v2213_v31 = vld [vmem:[%s3516_s5 + $0x348] sm:$0xff] }
 0x115   : > { %1199 = vmatpush.msrb.mxu3 %v2124_v56  ;;  %1345 = vmatpush.msra.mxu0 %v2144_v36  ;;  %v1142_v56 = vld [vmem:[%s3516_s5 + $0x58] sm:$0xff]  ;;  %v2183_v36 = vld [vmem:[%s3516_s5 + $0x288] sm:$0xff] }
 0x116   : > { %1255 = vmatpush.msra.mxu2 %v1149_v52  ;;  %2165 = vmatpush.msk.msrb.mxu1 %vm543_vm0, %v2161_v37  ;;  %v1144_v52 = vld [vmem:[%s3516_s5 + $0x68] sm:$0xff]  ;;  %v2211_v37 = vld [vmem:[%s3516_s5 + $0x338] sm:$0xff] }
 0x117   : > { %1200 = vmatpush.msrb.mxu3 %v2122_v58  ;;  %1346 = vmatpush.msra.mxu0 %v2142_v40  ;;  %v2172_v58 = vld [vmem:[%s3516_s5 + $0x230] sm:$0xff]  ;;  %v2179_v40 = vld [vmem:[%s3516_s5 + $0x268] sm:$0xff] }
 0x118   : > { %1256 = vmatpush.msra.mxu2 %v1147_v55  ;;  %1361 = vmatpush.msrb.mxu1 %v2159_v41  ;;  %v2212_v55 = vld [vmem:[%s3516_s5 + $0x340] sm:$0xff]  ;;  %v2207_v41 = vld [vmem:[%s3516_s5 + $0x318] sm:$0xff] }
 0x119   : > { %1201 = vmatpush.msrb.mxu3 %v2120_v62  ;;  %1347 = vmatpush.msra.mxu0 %v2140_v44  ;;  %v2170_v62 = vld [vmem:[%s3516_s5 + $0x220] sm:$0xff]  ;;  %v2205_v44 = vld [vmem:[%s3516_s5 + $0x308] sm:$0xff] }
 0x11a   : > { %2103 = vmatmul.msk.f32.gmra.mxu3 %vm492_vm1, %v998_v45  ;;  %1257 = vmatpush.msra.mxu2 %v1145_v60  ;;  %v2157_v45 = vld [vmem:[%s3516_s5 + $0x1e8] sm:$0xff] }
 0x11b   : > { %1202 = vmatpush.msrb.mxu3 %v2118_v4  ;;  %1362 = vmatpush.msrb.mxu1 %v2157_v45  ;;  %v1140_v60 = vld [vmem:[%s3516_s5 + $0x48] sm:$0xff]  ;;  %v2206_v4 = vld [vmem:[%s3516_s5 + $0x310] sm:$0xff] }
 0x11c   : > { %1258 = vmatpush.msra.mxu2 %v1143_v1  ;;  %v2147_v1 = vld [vmem:[%s3516_s5 + $0x198] sm:$0xff] }
 0x11d   : > { %1203 = vmatpush.msrb.mxu3 %v2116_v9  ;;  %1363 = vmatpush.msrb.mxu1 %v2155_v49  ;;  %v1134_v9 = vld [vmem:[%s3516_s5 + $0x18] sm:$0xff] }
 0x11e   : > { %1259 = vmatpush.msra.mxu2 %v1141_v6  ;;  %v2145_v6 = vld [vmem:[%s3516_s5 + $0x188] sm:$0xff]  ;;  %v2173_v49 = vld [vmem:[%s3516_s5 + $0x238] sm:$0xff] }
 0x11f   : > { %1204 = vmatpush.msrb.mxu3 %v2114_v13  ;;  %1364 = vmatpush.msrb.mxu1 %v2153_v53  ;;  %v2141_v13 = vld [vmem:[%s3516_s5 + $0x168] sm:$0xff]  ;;  %v2169_v53 = vld [vmem:[%s3516_s5 + $0x218] sm:$0xff] }
 0x120   : > { %1260 = vmatpush.msra.mxu2 %v1139_v11  ;;  %v2202_v11 = vld [vmem:[%s3516_s5 + $0x2f0] sm:$0xff] }
 0x121   : > { %1205 = vmatpush.msrb.mxu3 %v2112_v15  ;;  %1365 = vmatpush.msrb.mxu1 %v2151_v57  ;;  %v2196_v15 = vld [vmem:[%s3516_s5 + $0x2c0] sm:$0xff] }
 0x122   : > { %1261 = vmatpush.msra.mxu2 %v1137_v7  ;;  %v2198_v7 = vld [vmem:[%s3516_s5 + $0x2d0] sm:$0xff] }
 0x123   : > { %1206 = vmatpush.msrb.mxu3 %v2110_v20  ;;  %1366 = vmatpush.msrb.mxu1 %v2149_v61 }
 0x124   : > { %1262 = vmatpush.msra.mxu2 %v1135_v17 }
 0x125   : > { %1207 = vmatpush.msrb.mxu3 %v2108_v30  ;;  %1367 = vmatpush.msrb.mxu1 %v2147_v1 }
 0x126   : > { %1263 = vmatpush.msra.mxu2 %v1133_v16 }
 0x127   : > { %1208 = vmatpush.msrb.mxu3 %v2106_v34  ;;  %1368 = vmatpush.msrb.mxu1 %v2145_v6  ;;  %v2185_v34 = vld [vmem:[%s3516_s5 + $0x298] sm:$0xff] }
 0x128   : > { %1264 = vmatpush.msra.mxu2 %v1131_v22 }
 0x129   : > { %2137 = vmatpush.msk.msra.mxu3 %vm543_vm0, %v1152_v35  ;;  %1369 = vmatpush.msrb.mxu1 %v2143_v10 }
 0x12b   : > { %1278 = vmatpush.msra.mxu3 %v1150_v39  ;;  %1370 = vmatpush.msrb.mxu1 %v2141_v13  ;;  %v2209_v39 = vld [vmem:[%s3516_s5 + $0x328] sm:$0xff] }
 0x12d   : > { %1279 = vmatpush.msra.mxu3 %v1148_v43 }
 0x12f   : > { %1280 = vmatpush.msra.mxu3 %v1146_v48 }
 0x131   : > { %1281 = vmatpush.msra.mxu3 %v1144_v52  ;;  %v2199_v52 = vld [vmem:[%s3516_s5 + $0x2d8] sm:$0xff] }
 0x133   : > { %1282 = vmatpush.msra.mxu3 %v1142_v56 }
 0x135   : > { %1283 = vmatpush.msra.mxu3 %v1140_v60 }
 0x137   : > { %1284 = vmatpush.msra.mxu3 %v1138_v0 }
 0x139   : > { %1285 = vmatpush.msra.mxu3 %v1136_v5 }
 0x13b   : > { %1286 = vmatpush.msra.mxu3 %v1134_v9 }
 0x13d   : > { %1287 = vmatpush.msra.mxu3 %v1132_v12 }
 0x18c   : > { %v1028_v19 = vpop.f32.mrf.mxu2 }
 0x18d   : > { %1101 = vmatmul.f32.vlgmr.msrb.gmra.mxu0 %v1028_v19 }
 0x18e   : > { %2218 = vmatpush.msk.msrb.mxu0 %vm543_vm0, %v2216_v47  ;;  %v2203_v47 = vld [vmem:[%s3516_s5 + $0x2f8] sm:$0xff] }
 0x190   : > { %1511 = vmatpush.msrb.mxu0 %v2214_v51  ;;  %v2171_v51 = vld [vmem:[%s3516_s5 + $0x228] sm:$0xff] }
 0x192   : > { %1512 = vmatpush.msrb.mxu0 %v2212_v55 }
 0x194   : > { %v1031_v26 = vpop.f32.mrf.mxu2  ;;  %1513 = vmatpush.msrb.mxu0 %v2210_v59 }
 0x195   : > { %v1051_v24 = vpop.f32.mrf.mxu3  ;;  %1104 = vmatmul.f32.gmra.mxu0 %v1031_v26  ;;  %v2189_v26 = vld [vmem:[%s3516_s5 + $0x2b8] sm:$0xf] }
 0x196   : > { %2104 = vmatmul.msk.f32.vlgmr.msrb.gmra.mxu2 %vm1078_vm3, %v1051_v24  ;;  %1514 = vmatpush.msrb.mxu0 %v2208_v63 }
 0x197   : > { %2190 = vmatpush.msk.msrb.mxu2 %vm543_vm0, %v2188_v23 }
 0x198   : > { %1515 = vmatpush.msrb.mxu0 %v2206_v4 }
 0x199   : > { %1425 = vmatpush.msrb.mxu2 %v2186_v29  ;;  %v2217_v29 = vld [vmem:[%s3516_s5 + $0x368] sm:$0xf] }
 0x19a   : > { %1516 = vmatpush.msrb.mxu0 %v2204_v8  ;;  %v3169_v8 = vld [vmem:[%s3517_s6] sm:$0x3] }
 0x19b   : > { %1426 = vmatpush.msrb.mxu2 %v2184_v33  ;;  %v1557_v13 = vperm.slane %v3169_v8, 0 }
 0x19c   : > { %1517 = vmatpush.msrb.mxu0 %v2202_v11 }
 0x19d   : > { %v1054_v27 = vpop.f32.mrf.mxu3  ;;  %1427 = vmatpush.msrb.mxu2 %v2182_v38  ;;  %v2181_v38 = vld [vmem:[%s3516_s5 + $0x278] sm:$0xff] }
 0x19e   : > { %2105 = vmatmul.msk.f32.gmra.mxu2 %vm1078_vm3, %v1054_v27  ;;  %1518 = vmatpush.msrb.mxu0 %v2200_v2 }
 0x19f   : > { %1428 = vmatpush.msrb.mxu2 %v2180_v42  ;;  %v2177_v42 = vld [vmem:[%s3516_s5 + $0x258] sm:$0xff] }
 0x1a0   : > { %1519 = vmatpush.msrb.mxu0 %v2198_v7 }
 0x1a1   : > { %1429 = vmatpush.msrb.mxu2 %v2178_v46  ;;  %v2175_v46 = vld [vmem:[%s3516_s5 + $0x248] sm:$0xff] }
 0x1a2   : > { %1520 = vmatpush.msrb.mxu0 %v2196_v15  ;;  %v1636_v15 = vld [vmem:[%s3519_s8 + $0x78] sm:$0xff] }
 0x1a3   : > { %1430 = vmatpush.msrb.mxu2 %v2176_v50  ;;  %v2201_v50 = vld [vmem:[%s3516_s5 + $0x2e8] sm:$0xff] }
 0x1a5   : > { %1431 = vmatpush.msrb.mxu2 %v2174_v54  ;;  %v2197_v54 = vld [vmem:[%s3516_s5 + $0x2c8] sm:$0xff] }
 0x1a7   : > { %1432 = vmatpush.msrb.mxu2 %v2172_v58 }
 0x1a9   : > { %1433 = vmatpush.msrb.mxu2 %v2170_v62 }
 0x1ab   : > { %1434 = vmatpush.msrb.mxu2 %v2168_v3 }
 0x20a   : > { %v1102_v14 = vpop.f32.mrf.mxu0 }
 0x212   : > { %v1105_v19 = vpop.f32.mrf.mxu0 }
 0x219   : > { %v1125_v17 = vpop.f32.mrf.mxu2 }
 0x21a   : > { %v1126_v18 = vadd.f32 %v1125_v17, %v1102_v14  ;;  %v1635_v17 = vld [vmem:[%s3519_s8 + $0x70] sm:$0xff] }
 0x21c   : > { %2135 = vmatmul.msk.f32.vlgmr.msra.gmra.mxu2 %vm1182_vm4, %v1126_v18  ;;  %v1179_v21 = vrot.slane %v1126_v18, 1  ;;  %v1319_v23 = vrot.slane %v1126_v18, 2  ;;  %v1406_v33 = vrot.slane %v1126_v18, 3  ;;  %v1492_v45 = vrot.slane %v1126_v18, 4 }
 0x221   : > { %v1128_v20 = vpop.f32.mrf.mxu2 }
 0x222   : > { %v3060_v16 = vadd.f32 %v1128_v20, %v1105_v19 }
 0x224   : > { %2136 = vmatmul.msk.f32.gmra.mxu2 %vm1182_vm4, %v3060_v16  ;;  %v1180_v22 = vrot.slane %v3060_v16, 1  ;;  %v3066_v24 = vrot.slane %v3060_v16, 2  ;;  %v3078_v30 = vrot.slane %v3060_v16, 3  ;;  %v1493_v43 = vrot.slane %v3060_v16, 4 }
 0x226   : > { %v1181_v27 = vsel %vm1178_vm5, %v1179_v21, %v1180_v22  ;;  %v1321_v28 = vsel %vm1318_vm6, %v1319_v23, %v3066_v24  ;;  %v1408_v35 = vsel %vm1405_vm7, %v1406_v33, %v3078_v30  ;;  %v1494_v48 = vsel %vm543_vm0, %v1492_v45, %v1493_v43  ;;  %v1633_v23 = vld [vmem:[%s3519_s8 + $0x60] sm:$0xff]  ;;  %v1638_v33 = vld [vmem:[%s3519_s8 + $0x88] sm:$0xff] }
 0x227   : > { %2129 = vmatmul.msk.f32.vlgmr.msrb.gmra.mxu3 %vm1182_vm4, %v1181_v27  ;;  %2132 = vmatmul.msk.f32.vlgmr.msra.gmra.mxu1 %vm1182_vm4, %v1181_v27  ;;  %v1640_v27 = vld [vmem:[%s3519_s8 + $0x98] sm:$0xff] }
 0x228   : > { %2163 = vmatmul.msk.f32.vlgmr.msra.gmra.mxu0 %vm1182_vm4, %v1321_v28  ;;  %2193 = vmatpush.msk.msrb.mxu3 %vm543_vm0, %v2189_v26  ;;  %v1632_v26 = vld [vmem:[%s3519_s8 + $0x58] sm:$0xff] }
 0x229   : > { %2221 = vmatpush.msk.msra.mxu1 %vm543_vm0, %v2217_v29  ;;  %1645 = vmatpush.msra.mxu0 %v1636_v15  ;;  %v1631_v29 = vld [vmem:[%s3519_s8 + $0x50] sm:$0xff]  ;;  %v2246_v15 = vld [vmem:[%s3520_s9 + $0xc8] sm:$0xff] }
 0x22a   : > { %1448 = vmatpush.msrb.mxu3 %v2187_v25  ;;  %v1630_v25 = vld [vmem:[%s3519_s8 + $0x48] sm:$0xff] }
 0x22b   : > { %1534 = vmatpush.msra.mxu1 %v2215_v32  ;;  %1646 = vmatpush.msra.mxu0 %v1635_v17  ;;  %v2231_v17 = vld [vmem:[%s3520_s9 + $0x60] sm:$0xff] }
 0x22c   : > { %2191 = vmatmul.msk.f32.vlgmr.msrb.gmra.mxu2 %vm1182_vm4, %v1408_v35  ;;  %1449 = vmatpush.msrb.mxu3 %v2185_v34 }
 0x22d   : > { %1535 = vmatpush.msra.mxu1 %v2213_v31 }
 0x22e   : > { %1450 = vmatpush.msrb.mxu3 %v2183_v36  ;;  %v1628_v36 = vld [vmem:[%s3519_s8 + $0x38] sm:$0xff] }
 0x22f   : > { %2130 = vmatmul.msk.f32.gmra.mxu3 %vm1182_vm4, %v1180_v22  ;;  %2133 = vmatmul.msk.f32.gmra.mxu1 %vm1182_vm4, %v1180_v22 }
 0x230   : > { %2164 = vmatmul.msk.f32.gmra.mxu0 %vm1182_vm4, %v3066_v24  ;;  %1536 = vmatpush.msra.mxu1 %v2211_v37 }
 0x231   : > { %1451 = vmatpush.msrb.mxu3 %v2181_v38 }
 0x232   : > { %1537 = vmatpush.msra.mxu1 %v2209_v39  ;;  %v1627_v39 = vld [vmem:[%s3519_s8 + $0x30] sm:$0xff] }
 0x233   : > { %1452 = vmatpush.msrb.mxu3 %v2179_v40 }
 0x234   : > { %2192 = vmatmul.msk.f32.gmra.mxu2 %vm1182_vm4, %v3078_v30  ;;  %1538 = vmatpush.msra.mxu1 %v2207_v41  ;;  %v1626_v41 = vld [vmem:[%s3519_s8 + $0x28] sm:$0xff] }
 0x235   : > { %1453 = vmatpush.msrb.mxu3 %v2177_v42 }
 0x236   : > { %1539 = vmatpush.msra.mxu1 %v2205_v44  ;;  %v1625_v44 = vld [vmem:[%s3519_s8 + $0x20] sm:$0xff] }
 0x237   : > { %2138 = vmatmul.msk.f32.vlgmr.msra.gmra.mxu3 %vm1182_vm4, %v1126_v18  ;;  %2166 = vmatmul.msk.f32.vlgmr.msrb.gmra.mxu1 %vm1182_vm4, %v1321_v28  ;;  %v1569_v28 = vld [vmem:[%s3518_s7] sm:$0x1f] }
 0x238   : > { %2219 = vmatmul.msk.f32.vlgmr.msrb.gmra.mxu0 %vm1182_vm4, %v1494_v48  ;;  %1454 = vmatpush.msrb.mxu3 %v2175_v46 }
 0x239   : > { %1540 = vmatpush.msra.mxu1 %v2203_v47  ;;  %v1558_v47 = vperm.slane %v3169_v8, 1 }
 0x23a   : > { %1455 = vmatpush.msrb.mxu3 %v2173_v49 }
 0x23b   : > { %1541 = vmatpush.msra.mxu1 %v2201_v50 }
 0x23c   : > { %1456 = vmatpush.msrb.mxu3 %v2171_v51 }
 0x23d   : > { %1542 = vmatpush.msra.mxu1 %v2199_v52 }
 0x23e   : > { %1457 = vmatpush.msrb.mxu3 %v2169_v53 }
 0x23f   : > { %2139 = vmatmul.msk.f32.gmra.mxu3 %vm1182_vm4, %v3060_v16  ;;  %2167 = vmatmul.msk.f32.gmra.mxu1 %vm1182_vm4, %v3066_v24  ;;  %v1634_v16 = vld [vmem:[%s3519_s8 + $0x68] sm:$0xff] }
 0x240   : > { %2220 = vmatmul.msk.f32.gmra.mxu0 %vm1182_vm4, %v1493_v43  ;;  %1543 = vmatpush.msra.mxu1 %v2197_v54  ;;  %v1624_v54 = vld [vmem:[%s3519_s8 + $0x18] sm:$0xff] }
 0x241   : > { %1647 = vmatpush.msra.mxu0 %v1634_v16  ;;  %v1685_v16 = vld [vmem:[%s3520_s9] sm:$0xff] }
 0x243   : > { %1648 = vmatpush.msra.mxu0 %v1633_v23  ;;  %v2261_v23 = vld [vmem:[%s3520_s9 + $0x138] sm:$0xff] }
 0x245   : > { %1649 = vmatpush.msra.mxu0 %v1632_v26  ;;  %v2260_v26 = vld [vmem:[%s3520_s9 + $0x130] sm:$0xff] }
 0x247   : > { %2194 = vmatmul.msk.f32.vlgmr.msrb.gmra.mxu3 %vm1182_vm4, %v1408_v35  ;;  %2222 = vmatmul.msk.f32.vlgmr.msra.gmra.mxu1 %vm1182_vm4, %v1494_v48  ;;  %v1629_v35 = vld [vmem:[%s3519_s8 + $0x40] sm:$0xff] }
 0x248   : > { %1650 = vmatpush.msra.mxu0 %v1631_v29 }
 0x24a   : > { %1651 = vmatpush.msra.mxu0 %v1630_v25  ;;  %v2259_v25 = vld [vmem:[%s3520_s9 + $0x128] sm:$0xff] }
 0x24c   : > { %1652 = vmatpush.msra.mxu0 %v1629_v35  ;;  %v2242_v35 = vld [vmem:[%s3520_s9 + $0xa8] sm:$0xff] }
 0x24e   : > { %1653 = vmatpush.msra.mxu0 %v1628_v36  ;;  %v2257_v36 = vld [vmem:[%s3520_s9 + $0x118] sm:$0xff] }
 0x24f   : > { %2195 = vmatmul.msk.f32.gmra.mxu3 %vm1182_vm4, %v3078_v30  ;;  %2223 = vmatmul.msk.f32.gmra.mxu1 %vm1182_vm4, %v1493_v43  ;;  %v1639_v30 = vld [vmem:[%s3519_s8 + $0x90] sm:$0xff] }
 0x250   : > { %1654 = vmatpush.msra.mxu0 %v1627_v39  ;;  %v2256_v39 = vld [vmem:[%s3520_s9 + $0x110] sm:$0xff] }
 0x252   : > { %1655 = vmatpush.msra.mxu0 %v1626_v41  ;;  %v2255_v41 = vld [vmem:[%s3520_s9 + $0x108] sm:$0xff] }
 0x254   : > { %1656 = vmatpush.msra.mxu0 %v1625_v44  ;;  %v2263_v44 = vld [vmem:[%s3520_s9 + $0x140] sm:$0xff] }
 0x256   : > { %1657 = vmatpush.msra.mxu0 %v1624_v54 }
 0x29f   : > { %v1266_v55 = vpop.f32.mrf.mxu2 }
 0x2a4   : > { %v1233_v56 = vpop.f32.mrf.mxu1 }
 0x2a5   : > { %v1349_v57 = vpop.f32.mrf.mxu0 }
 0x2a7   : > { %v1269_v58 = vpop.f32.mrf.mxu2 }
 0x2aa   : > { %v1210_v59 = vpop.f32.mrf.mxu3 }
 0x2ab   : > { %v1267_v63 = vadd.f32 %v1266_v55, %v1210_v59  ;;  %v1637_v55 = vld [vmem:[%s3519_s8 + $0x80] sm:$0xff] }
 0x2ac   : > { %v1236_v60 = vpop.f32.mrf.mxu1  ;;  %v1693_v59 = vld [vmem:[%s3520_s9 + $0x40] sm:$0xff] }
 0x2ad   : > { %v1352_v61 = vpop.f32.mrf.mxu0  ;;  %v1378_v4 = vadd.f32 %v1349_v57, %v1267_v63  ;;  %v1622_v57 = vld [vmem:[%s3519_s8 + $0x8] sm:$0xff]  ;;  %v1692_v63 = vld [vmem:[%s3520_s9 + $0x38] sm:$0xff] }
 0x2af   : > { %v1436_v62 = vpop.f32.mrf.mxu2 }
 0x2b0   : > { %v1465_v10 = vadd.f32 %v1436_v62, %v1378_v4  ;;  %v1621_v62 = vld [vmem:[%s3519_s8] sm:$0xff] }
 0x2b1   : > { %v2235_v4 = vld [vmem:[%s3520_s9 + $0x80] sm:$0xff] }
 0x2b2   : > { %v1213_v0 = vpop.f32.mrf.mxu3 }
 0x2b3   : > { %v1270_v1 = vadd.f32 %v1269_v58, %v1213_v0  ;;  %v1694_v58 = vld [vmem:[%s3520_s9 + $0x48] sm:$0xff] }
 0x2b4   : > { %v1372_v5 = vpop.f32.mrf.mxu1  ;;  %v2236_v0 = vld [vmem:[%s3520_s9 + $0x88] sm:$0xff] }
 0x2b5   : > { %v1522_v3 = vpop.f32.mrf.mxu0  ;;  %v1380_v6 = vadd.f32 %v1352_v61, %v1270_v1  ;;  %v2237_v61 = vld [vmem:[%s3520_s9 + $0x90] sm:$0xff] }
 0x2b6   : > { %v1551_v12 = vadd.f32 %v1522_v3, %v1465_v10  ;;  %v1691_v1 = vld [vmem:[%s3520_s9 + $0x30] sm:$0xff]  ;;  %v2250_v3 = vld [vmem:[%s3520_s9 + $0xe8] sm:$0xff]  ;;  %v1689_v10 = vld [vmem:[%s3520_s9 + $0x20] sm:$0xff] }
 0x2b7   : > { %v1439_v9 = vpop.f32.mrf.mxu2 }
 0x2b8   : > { %v1467_v2 = vadd.f32 %v1439_v9, %v1380_v6  ;;  %v1561_v18 = vadd.f32 %v1557_v13, %v1551_v12  ;;  %v2249_v6 = vld [vmem:[%s3520_s9 + $0xe0] sm:$0xff]  ;;  %v2234_v9 = vld [vmem:[%s3520_s9 + $0x78] sm:$0xff]  ;;  %v2233_v12 = vld [vmem:[%s3520_s9 + $0x70] sm:$0xff] }
 0x2ba   : > { %v1289_v11 = vpop.f32.mrf.mxu3  ;;  %v1565_v24 = vmax.f32 %v1561_v18, 0.0  ;;  %v1686_v18 = vld [vmem:[%s3520_s9 + $0x8] sm:$0xff] }
 0x2bb   : > { %v1290_v32 = vadd.f32 %v1289_v11, %v1233_v56  ;;  %v1623_v56 = vld [vmem:[%s3519_s8 + $0x10] sm:$0xff]  ;;  %v2248_v11 = vld [vmem:[%s3520_s9 + $0xd8] sm:$0xff] }
 0x2bc   : > { %v1375_v19 = vpop.f32.mrf.mxu1  ;;  %1658 = vmatpush.msra.mxu0 %v1623_v56 }
 0x2bd   : > { %v1525_v7 = vpop.f32.mrf.mxu0  ;;  %v1379_v38 = vadd.f32 %v1372_v5, %v1290_v32  ;;  %v1690_v5 = vld [vmem:[%s3520_s9 + $0x28] sm:$0xff] }
 0x2be   : > { %v1553_v14 = vadd.f32 %v1525_v7, %v1467_v2  ;;  %1659 = vmatpush.msra.mxu0 %v1622_v57  ;;  %v2247_v2 = vld [vmem:[%s3520_s9 + $0xd0] sm:$0xff]  ;;  %v2232_v7 = vld [vmem:[%s3520_s9 + $0x68] sm:$0xff] }
 0x2bf   : > { %v2268_v32 = vld [vmem:[%s3520_s9 + $0x168] sm:$0xff] }
 0x2c0   : > { %v1563_v20 = vadd.f32 %v1557_v13, %v1553_v14  ;;  %1660 = vmatpush.msra.mxu0 %v1621_v62  ;;  %v1688_v13 = vld [vmem:[%s3520_s9 + $0x18] sm:$0xff]  ;;  %v1687_v14 = vld [vmem:[%s3520_s9 + $0x10] sm:$0xff] }
 0x2c1   : > { %v1867_v62 = vld [vmem:[%s3522_s11 + $0x30] sm:$0xff] }
 0x2c2   : > { %v1567_v21 = vmax.f32 %v1563_v20, 0.0  ;;  %v1292_v22 = vpop.f32.mrf.mxu3  ;;  %v2230_v20 = vld [vmem:[%s3520_s9 + $0x58] sm:$0xff] }
 0x2c3   : > { %v1293_v37 = vadd.f32 %v1292_v22, %v1236_v60  ;;  %v2238_v60 = vld [vmem:[%s3520_s9 + $0x98] sm:$0xff]  ;;  %v2229_v22 = vld [vmem:[%s3520_s9 + $0x50] sm:$0xff] }
 0x2c4   : > { %2224 = vmatpush.msk.msra.mxu2 %vm1574_vm8, %v1567_v21  ;;  %v1545_v34 = vpop.f32.mrf.mxu1  ;;  %1717 = vmatpush.msrb.mxu1 %v2238_v60  ;;  %v2272_v21 = vld [vmem:[%s3520_s9 + $0x188] sm:$0xff]  ;;  %v1869_v60 = vld [vmem:[%s3522_s11 + $0x40] sm:$0xff] }
 0x2c5   : > { %v1381_v42 = vadd.f32 %v1375_v19, %v1293_v37  ;;  %v2245_v19 = vld [vmem:[%s3520_s9 + $0xc0] sm:$0xff]  ;;  %v2266_v37 = vld [vmem:[%s3520_s9 + $0x158] sm:$0xff] }
 0x2c6   : > { %1596 = vmatpush.msra.mxu2 %v1565_v24  ;;  %1718 = vmatpush.msrb.mxu1 %v2237_v61  ;;  %v2271_v24 = vld [vmem:[%s3520_s9 + $0x180] sm:$0xff]  ;;  %v1868_v61 = vld [vmem:[%s3522_s11 + $0x38] sm:$0xff] }
 0x2c7   : > { %2225 = vmatmul.msk.f32.vlgmr.msra.gmra.mxu2 %vm1570_vm9, %v1569_v28 }
 0x2c8   : > { %1677 = vmatpush.msrb.mxu2 %v1640_v27  ;;  %1719 = vmatpush.msrb.mxu1 %v2236_v0  ;;  %v2270_v27 = vld [vmem:[%s3520_s9 + $0x178] sm:$0xff]  ;;  %v1865_v0 = vld [vmem:[%s3522_s11 + $0x20] sm:$0xff] }
 0x2ca   : > { %v1459_v31 = vpop.f32.mrf.mxu3  ;;  %1678 = vmatpush.msrb.mxu2 %v1639_v30  ;;  %1720 = vmatpush.msrb.mxu1 %v2235_v4  ;;  %v2244_v30 = vld [vmem:[%s3520_s9 + $0xb8] sm:$0xff]  ;;  %v1862_v4 = vld [vmem:[%s3522_s11 + $0x8] sm:$0xff] }
 0x2cb   : > { %v1466_v40 = vadd.f32 %v1459_v31, %v1379_v38  ;;  %v2267_v31 = vld [vmem:[%s3520_s9 + $0x160] sm:$0xff] }
 0x2cc   : > { %1679 = vmatpush.msrb.mxu2 %v1638_v33  ;;  %v1548_v48 = vpop.f32.mrf.mxu1  ;;  %1721 = vmatpush.msrb.mxu1 %v2234_v9  ;;  %v2243_v33 = vld [vmem:[%s3520_s9 + $0xb0] sm:$0xff]  ;;  %v2241_v38 = vld [vmem:[%s3520_s9 + $0xa0] sm:$0xff] }
 0x2cd   : > { %v1552_v45 = vadd.f32 %v1545_v34, %v1466_v40  ;;  %v2258_v34 = vld [vmem:[%s3520_s9 + $0x120] sm:$0xff]  ;;  %v2265_v40 = vld [vmem:[%s3520_s9 + $0x150] sm:$0xff] }
 0x2ce   : > { %1680 = vmatpush.msrb.mxu2 %v1637_v55  ;;  %1722 = vmatpush.msrb.mxu1 %v2233_v12  ;;  %v1910_v9 = vld [vmem:[%s3524_s13 + $0x40] sm:$0xff]  ;;  %v1907_v12 = vld [vmem:[%s3524_s13 + $0x28] sm:$0xff] }
 0x2cf   : > { %v1562_v51 = vadd.f32 %v1558_v47, %v1552_v45  ;;  %v2253_v45 = vld [vmem:[%s3520_s9 + $0xf8] sm:$0xff] }
 0x2d0   : > { %1773 = vmatpush.msra.mxu2 %v2250_v3  ;;  %1723 = vmatpush.msrb.mxu1 %v2232_v7  ;;  %v1863_v3 = vld [vmem:[%s3522_s11 + $0x10] sm:$0xff] }
 0x2d1   : > { %v1566_v53 = vmax.f32 %v1562_v51, 0.0  ;;  %v1871_v51 = vld [vmem:[%s3522_s11 + $0x50] sm:$0xff] }
 0x2d2   : > { %v1462_v43 = vpop.f32.mrf.mxu3  ;;  %1774 = vmatpush.msra.mxu2 %v2249_v6  ;;  %1724 = vmatpush.msrb.mxu1 %v2231_v17  ;;  %v1912_v6 = vld [vmem:[%s3524_s13 + $0x50] sm:$0xf] }
 0x2d3   : > { %v1468_v46 = vadd.f32 %v1462_v43, %v1381_v42  ;;  %v2264_v42 = vld [vmem:[%s3520_s9 + $0x148] sm:$0xff]  ;;  %v2254_v43 = vld [vmem:[%s3520_s9 + $0x100] sm:$0xff]  ;;  %2275 = vmatpush.msk.msrb.mxu0 %vm543_vm0, %v1912_v6 }
 0x2d4   : > { %1775 = vmatpush.msra.mxu2 %v2248_v11  ;;  %1725 = vmatpush.msrb.mxu1 %v2230_v20  ;;  %v1908_v11 = vld [vmem:[%s3524_s13 + $0x30] sm:$0xff] }
 0x2d5   : > { %v1554_v49 = vadd.f32 %v1548_v48, %v1468_v46  ;;  %v2252_v46 = vld [vmem:[%s3520_s9 + $0xf0] sm:$0xff]  ;;  %v1874_v48 = vld [vmem:[%s3522_s11 + $0x68] sm:$0xff] }
 0x2d6   : > { %1776 = vmatpush.msra.mxu2 %v2247_v2  ;;  %1726 = vmatpush.msrb.mxu1 %v2229_v22  ;;  %v1905_v2 = vld [vmem:[%s3524_s13 + $0x18] sm:$0xff] }
 0x2d7   : > { %v1564_v50 = vadd.f32 %v1558_v47, %v1554_v49  ;;  %v1875_v47 = vld [vmem:[%s3522_s11 + $0x70] sm:$0xff]  ;;  %v1873_v49 = vld [vmem:[%s3522_s11 + $0x60] sm:$0xff] }
 0x2d8   : > { %1777 = vmatpush.msra.mxu2 %v2246_v15  ;;  %1808 = vmatpush.msra.mxu1 %v2261_v23 }
 0x2d9   : > { %v1568_v52 = vmax.f32 %v1564_v50, 0.0  ;;  %v1872_v50 = vld [vmem:[%s3522_s11 + $0x58] sm:$0xff] }
 0x2da   : > { %1778 = vmatpush.msra.mxu2 %v2245_v19  ;;  %1809 = vmatpush.msra.mxu1 %v2260_v26  ;;  %v1904_v26 = vld [vmem:[%s3524_s13 + $0x10] sm:$0xff] }
 0x2db   : > { %2226 = vmatpush.msk.msra.mxu3 %vm1574_vm8, %v1568_v52  ;;  %v1870_v52 = vld [vmem:[%s3522_s11 + $0x48] sm:$0xff] }
 0x2dc   : > { %1779 = vmatpush.msra.mxu2 %v2244_v30  ;;  %1810 = vmatpush.msra.mxu1 %v2259_v25 }
 0x2dd   : > { %1616 = vmatpush.msra.mxu3 %v1566_v53 }
 0x2de   : > { %2227 = vmatmul.msk.f32.vlgmr.msra.gmra.mxu3 %vm1570_vm9, %v1569_v28  ;;  %v2269_v28 = vld [vmem:[%s3520_s9 + $0x170] sm:$0xff]  ;;  %1780 = vmatpush.msra.mxu2 %v2243_v33  ;;  %v1913_v33 = vld [vmem:[%s3525_s14] sm:$0x1] }
 0x2df   : > { %1739 = vmatpush.msrb.mxu3 %v1694_v58  ;;  %1811 = vmatpush.msra.mxu1 %v2258_v34 }
 0x2e0   : > { %1781 = vmatpush.msra.mxu2 %v2242_v35 }
 0x2e1   : > { %1740 = vmatpush.msrb.mxu3 %v1693_v59  ;;  %1812 = vmatpush.msra.mxu1 %v2257_v36 }
 0x2e2   : > { %1782 = vmatpush.msra.mxu2 %v2241_v38 }
 0x2e3   : > { %1741 = vmatpush.msrb.mxu3 %v1692_v63  ;;  %1813 = vmatpush.msra.mxu1 %v2256_v39  ;;  %v1866_v63 = vld [vmem:[%s3522_s11 + $0x28] sm:$0xff] }
 0x2e5   : > { %1742 = vmatpush.msrb.mxu3 %v1691_v1  ;;  %1814 = vmatpush.msra.mxu1 %v2255_v41  ;;  %v1864_v1 = vld [vmem:[%s3522_s11 + $0x18] sm:$0xff] }
 0x2e7   : > { %1743 = vmatpush.msrb.mxu3 %v1690_v5  ;;  %1815 = vmatpush.msra.mxu1 %v2254_v43  ;;  %v1861_v5 = vld [vmem:[%s3522_s11] sm:$0xff] }
 0x2e9   : > { %1744 = vmatpush.msrb.mxu3 %v1689_v10  ;;  %1816 = vmatpush.msra.mxu1 %v2253_v45  ;;  %v1909_v10 = vld [vmem:[%s3524_s13 + $0x38] sm:$0xff] }
 0x2eb   : > { %1745 = vmatpush.msrb.mxu3 %v1688_v13  ;;  %1817 = vmatpush.msra.mxu1 %v2252_v46  ;;  %v1906_v13 = vld [vmem:[%s3524_s13 + $0x20] sm:$0xff] }
 0x2ed   : > { %1746 = vmatpush.msrb.mxu3 %v1687_v14 }
 0x2ef   : > { %1747 = vmatpush.msrb.mxu3 %v1686_v18 }
 0x2f1   : > { %1748 = vmatpush.msrb.mxu3 %v1685_v16 }
 0x2f3   : > { %1843 = vmatpush.msra.mxu3 %v2272_v21  ;;  %v1858_v21 = vld [vmem:[%s3521_s10] sm:$0x1] }
 0x2f5   : > { %1844 = vmatpush.msra.mxu3 %v2271_v24 }
 0x2f7   : > { %1845 = vmatpush.msra.mxu3 %v2270_v27  ;;  %v1903_v27 = vld [vmem:[%s3524_s13 + $0x8] sm:$0xff] }
 0x2f9   : > { %1846 = vmatpush.msra.mxu3 %v2269_v28  ;;  %v1902_v28 = vld [vmem:[%s3524_s13] sm:$0xff] }
 0x2fb   : > { %1847 = vmatpush.msra.mxu3 %v2268_v32 }
 0x2fd   : > { %1848 = vmatpush.msra.mxu3 %v2267_v31 }
 0x2ff   : > { %1849 = vmatpush.msra.mxu3 %v2266_v37 }
 0x301   : > { %1850 = vmatpush.msra.mxu3 %v2265_v40 }
 0x303   : > { %1851 = vmatpush.msra.mxu3 %v2264_v42 }
 0x305   : > { %1852 = vmatpush.msra.mxu3 %v2263_v44 }
 0x34a   : > { %v1598_v8 = vpop.f32.mrf.mxu2 }
 0x34b   : > { %1661 = vmatmul.f32.vlgmr.msra.gmra.mxu0 %v1598_v8  ;;  %v1911_v8 = vld [vmem:[%s3524_s13 + $0x48] sm:$0xff] }
 0x34c   : > { %1926 = vmatpush.msrb.mxu0 %v1911_v8 }
 0x34e   : > { %1927 = vmatpush.msrb.mxu0 %v1910_v9 }
 0x350   : > { %1928 = vmatpush.msrb.mxu0 %v1909_v10 }
 0x352   : > { %1929 = vmatpush.msrb.mxu0 %v1908_v11 }
 0x354   : > { %1930 = vmatpush.msrb.mxu0 %v1907_v12 }
 0x356   : > { %1931 = vmatpush.msrb.mxu0 %v1906_v13 }
 0x358   : > { %1932 = vmatpush.msrb.mxu0 %v1905_v2 }
 0x35a   : > { %1933 = vmatpush.msrb.mxu0 %v1904_v26 }
 0x35c   : > { %1934 = vmatpush.msrb.mxu0 %v1903_v27 }
 0x35e   : > { %1935 = vmatpush.msrb.mxu0 %v1902_v28 }
 0x361   : > { %v1618_v29 = vpop.f32.mrf.mxu3 }
 0x362   : > { %2228 = vmatmul.msk.f32.vlgmr.msrb.gmra.mxu2 %vm1641_vm10, %v1618_v29  ;;  %v1876_v29 = vld [vmem:[%s3523_s12] sm:$0x1] }
 0x363   : > { %1882 = vmatpush.msrb.mxu2 %v1875_v47 }
 0x365   : > { %1883 = vmatpush.msrb.mxu2 %v1874_v48 }
 0x367   : > { %1884 = vmatpush.msrb.mxu2 %v1873_v49 }
 0x369   : > { %1885 = vmatpush.msrb.mxu2 %v1872_v50 }
 0x36b   : > { %1886 = vmatpush.msrb.mxu2 %v1871_v51 }
 0x36d   : > { %1887 = vmatpush.msrb.mxu2 %v1870_v52 }
 0x36f   : > { %1888 = vmatpush.msrb.mxu2 %v1869_v60 }
 0x371   : > { %1889 = vmatpush.msrb.mxu2 %v1868_v61 }
 0x373   : > { %1890 = vmatpush.msrb.mxu2 %v1867_v62 }
 0x375   : > { %1891 = vmatpush.msrb.mxu2 %v1866_v63 }
 0x377   : > { %1892 = vmatpush.msrb.mxu2 %v1865_v0 }
 0x379   : > { %1893 = vmatpush.msrb.mxu2 %v1864_v1 }
 0x37b   : > { %1894 = vmatpush.msrb.mxu2 %v1863_v3 }
 0x37d   : > { %1895 = vmatpush.msrb.mxu2 %v1862_v4 }
 0x37f   : > { %1896 = vmatpush.msrb.mxu2 %v1861_v5 }
 0x3c8   : > { %v1662_v53 = vpop.f32.mrf.mxu0 }
 0x3e5   : > { %v1682_v54 = vpop.f32.mrf.mxu2 }
 0x3e6   : > { %v1683_v55 = vadd.f32 %v1682_v54, %v1662_v53 }
 0x3e8   : > { %2240 = vmatmul.msk.f32.vlgmr.msrb.gmra.mxu3 %vm1708_vm11, %v1683_v55  ;;  %v1707_v56 = vrot.slane %v1683_v55, 1  ;;  %v1764_v57 = vrot.slane %v1683_v55, 2  ;;  %v1834_v58 = vrot.slane %v1683_v55, 4  ;;  %v1799_v59 = vrot.slane %v1683_v55, 3 }
 0x3ea   : > { %2239 = vmatmul.msk.f32.vlgmr.msrb.gmra.mxu1 %vm1708_vm11, %v1707_v56  ;;  %2251 = vmatmul.msk.f32.vlgmr.msra.gmra.mxu2 %vm1708_vm11, %v1764_v57 }
 0x3f0   : > { %2273 = vmatmul.msk.f32.vlgmr.msra.gmra.mxu3 %vm1708_vm11, %v1834_v58 }
 0x3f2   : > { %2262 = vmatmul.msk.f32.vlgmr.msra.gmra.mxu1 %vm1708_vm11, %v1799_v59 }
 0x467   : > { %v1728_v7 = vpop.f32.mrf.mxu1 }
 0x46b   : > { %v1750_v14 = vpop.f32.mrf.mxu3 }
 0x46c   : > { %v1751_v15 = vadd.f32 %v1750_v14, %v1728_v7 }
 0x46d   : > { %v1784_v17 = vpop.f32.mrf.mxu2 }
 0x46e   : > { %v1787_v18 = vadd.f32 %v1784_v17, %v1751_v15 }
 0x46f   : > { %v1819_v19 = vpop.f32.mrf.mxu1 }
 0x470   : > { %v1822_v20 = vadd.f32 %v1819_v19, %v1787_v18 }
 0x473   : > { %v1854_v16 = vpop.f32.mrf.mxu3 }
 0x474   : > { %v1857_v22 = vadd.f32 %v1854_v16, %v1822_v20 }
 0x476   : > { %v1859_v23 = vadd.f32 %v1858_v21, %v1857_v22 }
 0x478   : > { %v1860_v24 = vmax.f32 %v1859_v23, 0.0 }
 0x47a   : > { %2274 = vmatmul.msk.f32.vlgmr.msrb.gmra.mxu2 %vm1877_vm12, %v1860_v24 }
 0x4fd   : > { %v1898_v30 = vpop.f32.mrf.mxu2 }
 0x4fe   : > { %v1899_v25 = vadd.f32 %v1898_v30, %v1876_v29 }
 0x500   : > { %v1901_v32 = vmax.f32 %v1899_v25, 0.0 }
 0x502   : > { %2276 = vmatmul.msk.f32.vlgmr.msrb.gmra.mxu0 %vm1182_vm4, %v1901_v32 }
 0x57f   : > { %v1937_v34 = vpop.f32.mrf.mxu0 }
 0x580   : > { %v1938_v31 = vadd.f32 %v1937_v34, %v1913_v33 }
 0x582   : > { %1941 = vst.msk [vmem:[%s486_s17] sm:$0x1] %vm1940_vm13, %v1938_v31 }
 0x583   : > { %2351 = shalt.err (!%p2348_p3)
}
 0x584   : > { %2284 = dma.vmem_to_hbm [thread:$0]  (%p2507_p5), %s1954_s29, 16, %s1956_s23, %s1943_s25  }
 0x585 PF: > { %s3541_s20 = sld [smem:[#allocation6_spill]]  ;;  %p2290_p4 = scmp.ge.s32.totalorder %s2386_s21, 2 }
 0x587   : > { %p2287_p7 = pnand %p2290_p4, %p2511_p6 }
 0x589   : > { %p2288_p8 = pneg %p2287_p7 }
 0x58b   : > { %s1967_s17 = sand.u32 1, %s3541_s20  }
 0x58c   : > { %s1968_s22 = scalar_lea.sflag [#allocation4], %s1967_s17 }
 0x58d   : > { %2369 = dma.done.wait (%p2288_p8), %s1968_s22, 16  }
 0x58e   : > { %2371 = vsyncadd (%p2288_p8), %s1968_s22, 4294967280  ;;  %s3543_s21 = sld [smem:[#allocation8_spill]]  ;;  %s3546_s18 = smov %s2378_s19 }
 0x58f   : > { %s3544_s0 = sld [smem:[#allocation7_spill]] }
 0x590   : > { %s3545_s20 = sld [smem:[#allocation9_spill]] }
 0x594   : > { %p25_p9 = scmp.ge.s32.totalorder %s3543_s21, 4  }
 0x595   : > { %s3547_s19 = smov %s3544_s0 }
 0x596   :  { %27 = sbr.rel (!%p25_p9) target bundleno = 5 (0x5), region = 127 }
 0x59b   :  { %1973 = vsyncpa [#allocation4], 1 }
 0x59c   :  { %1975 = vsyncpa [#allocation4 + $0x1], 1 }

</bundles_post_ra>
